<compile_context>
chip_gen: v5e
topology: v5e:2x2
jax: 0.10.0
libtpu: 0.0.40
codegen_flags: <defaults>
</compile_context>

<pallas_src>
import math

import jax
import jax.numpy as jnp
from jax.experimental import pallas as pl
from jax.experimental.pallas import tpu as pltpu

# --- hyper-parameters (small, consistent with the module) ---
HIDDEN = 32          # hidden_dim
NUM_HEADS = 1        # see NOTE above
HEAD_DIM = HIDDEN // NUM_HEADS
NUM_RADIAL = 16
CUTOFF = 10.0
E = 16               # number of edges (<= 64 -> torch forward takes _full_attention)
P = E * E            # flat pair axis (lane-dense inside the kernel)
N_NODES = 12
LN_EPS = 1e-5
NEG_INF = -1e30


def _silu(x):
    return x * jax.nn.sigmoid(x)


def _edge_attention_kernel(featT_ref, cenT_ref, crdT_ref, selq_ref, selk_ref,
                           wmat_ref, w1r_ref, cols_ref, rows_ref,
                           featout_ref, coordout_ref):
    f32 = jnp.float32
    featT = featT_ref[...]            # (H, E)   edge features, hidden on sublanes
    cenT = cenT_ref[...]              # (3, E)   edge-center coords
    selq = selq_ref[...]              # (E, P)   selq[i, i*E+j] = 1  (query-edge selector)
    selk = selk_ref[...]              # (E, P)   selk[j, i*E+j] = 1  (key-edge selector)
    W = wmat_ref[...]                 # (256, H) packed matrices
    CS = cols_ref[...]                # (H, 16)  packed bias/constant columns
    RS = rows_ref[...]                # (8, H)   packed row vectors + scalars

    # --- fused per-edge projection: one MXU matmul covers q/k/v, q.k, and the gate layer 1 ---
    proj = jnp.dot(W[0:192, :], featT, preferred_element_type=f32)        # (192, E)

    # broadcast per-edge quantities onto the flat pair axis (lane-dense, MXU)
    qsideB = jnp.dot(proj[0:64, :], selq, preferred_element_type=f32)     # (64, P)
    ksideB = jnp.dot(proj[64:160, :], selk, preferred_element_type=f32)   # (96, P)
    q1B = qsideB[0:32, :]             # a1_q-projected query features
    qmB = qsideB[32:64, :]            # (wk^T wq) x_i     (query side of q.k)
    k1B = ksideB[0:32, :]             # a1_k-projected key features
    fkB = ksideB[32:64, :]            # raw key features  (key side of q.k)
    vkB = ksideB[64:96, :]            # value of the key edge
    ghp = proj[160:192, :]            # gate-MLP layer-1 pre-activation (per edge, (H, E))

    # --- pairwise geometry, flat over pairs (never materializes (E,E,3)) ---
    cqB = jnp.dot(cenT, selq, preferred_element_type=f32)                 # (3, P) c_i
    ckB = jnp.dot(cenT, selk, preferred_element_type=f32)                 # (3, P) c_j
    diffT = cqB - ckB                                                     # c_i - c_j (exact)
    dist2 = jnp.sum(diffT * diffT, axis=0, keepdims=True)                 # (1, P), >= 0 exactly
    dist = jnp.sqrt(dist2)
    in_cut = dist <= CUTOFF           # (1, P); diagonal pairs have dist == 0, so always valid

    # --- radial basis features, (R, P) lane-dense ---
    centers = CS[0:NUM_RADIAL, 7:8]   # (R, 1)
    widths = CS[0:NUM_RADIAL, 8:9]    # (R, 1)
    rbf = jnp.exp(-widths * (dist - centers) ** 2) * in_cut.astype(f32)   # (R, P)

    # --- attention MLP, transposed layout: hidden on sublanes, pairs on lanes ---
    b1 = CS[:, 0:1]
    b2 = CS[:, 1:2]
    w1d = CS[:, 2:3]
    dotf = jnp.sum(qmB * fkB, axis=0, keepdims=True)                      # (1, P)  q_i . k_j
    h1 = _silu(jnp.dot(w1r_ref[...], rbf, preferred_element_type=f32)
               + q1B + k1B + w1d * dotf + b1)                             # (H, P)
    h2 = _silu(jnp.dot(W[192:224, :], h1, preferred_element_type=f32) + b2)  # (H, P)
    a3_row = RS[0:1, :]
    a3b = RS[2:3, 0:1]
    scores = jnp.dot(a3_row, h2, preferred_element_type=f32) + a3b        # (1, P)  (MXU reduce)
    scores = jnp.where(in_cut, scores, NEG_INF)

    # --- softmax over key edges, done on the flat pair axis (exact per-row max, no reshapes) ---
    seg = selq > 0.0
    scores_seg = jnp.where(seg, scores, -jnp.inf)                         # (E, P)
    m_row = jnp.max(scores_seg, axis=1, keepdims=True)                    # (E, 1) per-query max
    shifted = jnp.max(scores_seg - m_row, axis=0, keepdims=True)          # (1, P) score - rowmax
    pexp = jnp.exp(shifted)                                               # (1, P)
    s_row = jax.lax.dot_general(pexp, selq, (((1,), (1,)), ((), ())),
                                preferred_element_type=f32)               # (1, E) row sums
    s_flat = jnp.dot(s_row, selq, preferred_element_type=f32)             # (1, P)
    attn = pexp / s_flat                                                  # (1, P) rows sum to 1

    # --- invariant feature update: attn @ v, out_proj, residual, LayerNorm (transposed) ---
    updT = jax.lax.dot_general(vkB * attn, selq, (((1,), (1,)), ((), ())),
                               preferred_element_type=f32)                # (H, E)
    bo = CS[:, 4:5]
    lnw = CS[:, 5:6]
    lnb = CS[:, 6:7]
    outT = jnp.dot(W[224:256, :], updT, preferred_element_type=f32) + bo  # (H, E)
    resT = featT + outT
    mu = jnp.mean(resT, axis=0, keepdims=True)
    var = jnp.mean((resT - mu) ** 2, axis=0, keepdims=True)
    featout_ref[...] = (resT - mu) * jax.lax.rsqrt(var + LN_EPS) * lnw + lnb

    # --- equivariant coordinate update (gate taken from the *query* edge, as in _full_attention) ---
    g1b = CS[:, 3:4]
    g2_row = RS[1:2, :]
    g2b = RS[2:3, 1:2]
    gh = _silu(ghp + g1b)                                                 # (H, E)
    gate = jax.nn.sigmoid(jnp.dot(g2_row, gh, preferred_element_type=f32) + g2b)  # (1, E)
    cuT = jax.lax.dot_general(diffT * attn, selq, (((1,), (1,)), ((), ())),
                              preferred_element_type=f32)                 # (3, E) = sum_j a_ij (c_i-c_j)
    coordout_ref[...] = crdT_ref[...] + gate * cuT


def pallas_forward(params, edge_features, edge_coords, edge_index, node_coords):
    """Forward pass (attention_mask=None). Glue (gather, weight packing) is plain JAX on host."""
    p = params
    center = (node_coords[edge_index[0]] + node_coords[edge_index[1]]) / 2.0   # (E, 3)

    a1 = p["a1"]                                    # (H, 2*Dh + R + 1), torch layout
    w1q_blk = a1[:, :HEAD_DIM]                      # (H, Dh)
    w1k_blk = a1[:, HEAD_DIM:2 * HEAD_DIM]
    w1r = a1[:, 2 * HEAD_DIM:2 * HEAD_DIM + NUM_RADIAL]   # (H, R)
    w1d = a1[:, -1]                                 # (H,)

    # one packed matrix slab; all blocks applied with a single left-matmul against feat^T
    wmat = jnp.concatenate([
        w1q_blk @ p["wq"],                          # rows   0: 32  -> q1_T
        p["wk"].T @ p["wq"],                        # rows  32: 64  -> qm_T (query side of q.k)
        w1k_blk @ p["wk"],                          # rows  64: 96  -> k1_T
        jnp.eye(HIDDEN, dtype=jnp.float32),         # rows  96:128  -> feat_T (key side of q.k)
        p["wv"],                                    # rows 128:160  -> v_T
        p["g1"] @ p["wv"],                          # rows 160:192  -> gate layer-1 pre-act
        p["a2"],                                    # rows 192:224  -> attention MLP layer 2
        p["wo"],                                    # rows 224:256  -> out_proj
    ], axis=0)                                      # (256, H)

    zc = jnp.zeros((HIDDEN,), jnp.float32)
    pad_r = jnp.zeros((HIDDEN - NUM_RADIAL,), jnp.float32)
    cols = jnp.stack([
        p["a1b"], p["a2b"], w1d, p["g1b"], p["wob"], p["lnw"], p["lnb"],
        jnp.concatenate([p["rbf_c"], pad_r]),
        jnp.concatenate([p["rbf_w"], pad_r]),
    ] + [zc] * 7, axis=1)                           # (H, 16)

    rows = jnp.zeros((8, HIDDEN), jnp.float32)
    rows = rows.at[0, :].set(p["a3"][0])
    rows = rows.at[1, :].set(p["g2"][0])
    rows = rows.at[2, 0].set(p["a3b"][0])
    rows = rows.at[2, 1].set(p["g2b"][0])

    # 0/1 selection matrices for the flat pair axis p = i*E + j
    pid = jnp.arange(P)
    sel_q = (pid[None, :] // E == jnp.arange(E)[:, None]).astype(jnp.float32)   # (E, P)
    sel_k = (pid[None, :] % E == jnp.arange(E)[:, None]).astype(jnp.float32)    # (E, P)

    inputs = [edge_features.T, center.T, edge_coords.T, sel_q, sel_k,
              wmat, w1r, cols, rows]
    in_specs = [pl.BlockSpec(x.shape, lambda i: (0, 0)) for x in inputs]
    out_specs = (pl.BlockSpec((HIDDEN, E), lambda i: (0, 0)),
                 pl.BlockSpec((3, E), lambda i: (0, 0)))
    out_shape = (jax.ShapeDtypeStruct((HIDDEN, E), jnp.float32),
                 jax.ShapeDtypeStruct((3, E), jnp.float32))

    feat_out_T, coord_out_T = pl.pallas_call(
        _edge_attention_kernel,
        grid=(1,),                                   # single step: E=16 fits one invocation
        in_specs=in_specs,
        out_specs=out_specs,
        out_shape=out_shape,
        compiler_params=pltpu.CompilerParams(dimension_semantics=("arbitrary",)),
    )(*inputs)
    return feat_out_T.T, coord_out_T.T


# ------------------- deterministic parameter init (matches __init__/_init_weights) -------------------
def init_params(key):
    keys = jax.random.split(key, 9)

    def xavier(k, out_f, in_f):
        lim = math.sqrt(6.0 / (in_f + out_f))
        return jax.random.uniform(k, (out_f, in_f), jnp.float32, -lim, lim)

    in_dim = 2 * HEAD_DIM + NUM_RADIAL + 1
    return dict(
        wq=xavier(keys[0], HIDDEN, HIDDEN),
        wk=xavier(keys[1], HIDDEN, HIDDEN),
        wv=xavier(keys[2], HIDDEN, HIDDEN),
        a1=xavier(keys[3], HIDDEN, in_dim), a1b=jnp.zeros((HIDDEN,), jnp.float32),
        a2=xavier(keys[4], HIDDEN, HIDDEN), a2b=jnp.zeros((HIDDEN,), jnp.float32),
        a3=xavier(keys[5], NUM_HEADS, HIDDEN), a3b=jnp.zeros((NUM_HEADS,), jnp.float32),
        g1=xavier(keys[6], HIDDEN, HEAD_DIM), g1b=jnp.zeros((HIDDEN,), jnp.float32),
        g2=xavier(keys[7], 1, HIDDEN), g2b=jnp.zeros((1,), jnp.float32),
        wo=xavier(keys[8], HIDDEN, HIDDEN), wob=jnp.zeros((HIDDEN,), jnp.float32),
        lnw=jnp.ones((HIDDEN,), jnp.float32), lnb=jnp.zeros((HIDDEN,), jnp.float32),
        rbf_c=jnp.linspace(0.0, CUTOFF, NUM_RADIAL).astype(jnp.float32),
        rbf_w=jnp.full((NUM_RADIAL,), 0.5, jnp.float32),
    )


# ------------------- pure-JAX reference mirroring the PyTorch _full_attention -------------------
def reference_forward(p, feat, coords, edge_index, node_coords):
    center = (node_coords[edge_index[0]] + node_coords[edge_index[1]]) / 2.0
    e = feat.shape[0]
    q = feat @ p["wq"].T
    k = feat @ p["wk"].T
    v = feat @ p["wv"].T
    cd = center[:, None, :] - center[None, :, :]
    dist = jnp.sqrt(jnp.sum(cd * cd, axis=-1))
    rbf = jnp.exp(-p["rbf_w"] * (dist[..., None] - p["rbf_c"]) ** 2)
    rbf = rbf * (dist[..., None] <= CUTOFF).astype(jnp.float32)
    dot = q @ k.T
    inp = jnp.concatenate([
        jnp.broadcast_to(q[:, None, :], (e, e, HEAD_DIM)),
        jnp.broadcast_to(k[None, :, :], (e, e, HEAD_DIM)),
        rbf,
        dot[..., None]], axis=-1)
    h = _silu(inp @ p["a1"].T + p["a1b"])
    h = _silu(h @ p["a2"].T + p["a2b"])
    sc = (h @ p["a3"].T + p["a3b"])[..., 0]
    valid = jnp.eye(e, dtype=bool) | (dist <= CUTOFF)
    sc = jnp.where(valid, sc, -jnp.inf)
    attn = jax.nn.softmax(sc, axis=1)
    upd = (attn @ v) / NUM_HEADS
    res = feat + upd @ p["wo"].T + p["wob"]
    mean = res.mean(-1, keepdims=True)
    var = ((res - mean) ** 2).mean(-1, keepdims=True)
    feat_out = (res - mean) / jnp.sqrt(var + LN_EPS) * p["lnw"] + p["lnb"]
    gh = _silu(v @ p["g1"].T + p["g1b"])
    gate = jax.nn.sigmoid(gh @ p["g2"].T + p["g2b"])          # (E, 1), gate of query edge
    cu = jnp.sum(attn[..., None] * gate[:, None, :] * cd, axis=1)
    coord_out = coords + cu / NUM_HEADS
    return feat_out, coord_out


if __name__ == "__main__":
    # TODO(synk): the sparse (E > 64, torch.topk k-NN) path and the optional attention_mask
    # are not implemented; this covers the _full_attention path with attention_mask=None.
    key = jax.random.PRNGKey(0)
    kp, k1, k2, k3, k4 = jax.random.split(key, 5)
    params = init_params(kp)

    edge_features = jax.random.normal(k1, (E, HIDDEN), jnp.float32)
    edge_coords = jax.random.normal(k2, (E, 3), jnp.float32)
    node_coords = jax.random.normal(k3, (N_NODES, 3), jnp.float32) * 5.0  # some pairs beyond cutoff
    edge_index = jax.random.randint(k4, (2, E), 0, N_NODES)

    feat_out, coord_out = pallas_forward(params, edge_features, edge_coords, edge_index, node_coords)
    jax.block_until_ready((feat_out, coord_out))

    ref_f, ref_c = reference_forward(params, edge_features, edge_coords, edge_index, node_coords)
    assert jnp.allclose(feat_out, ref_f, atol=5e-4, rtol=5e-4), float(jnp.max(jnp.abs(feat_out - ref_f)))
    assert jnp.allclose(coord_out, ref_c, atol=5e-4, rtol=5e-4), float(jnp.max(jnp.abs(coord_out - ref_c)))
    print("KERNEL_OK")
</pallas_src>

<mosaic_0001>
module attributes {stable_mosaic.version = 11 : i64} {
  func.func @_edge_attention_kernel(%arg0: i32, %arg1: memref<32x16xf32, #tpu.memory_space<vmem>>, %arg2: memref<3x16xf32, #tpu.memory_space<vmem>>, %arg3: memref<3x16xf32, #tpu.memory_space<vmem>>, %arg4: memref<16x256xf32, #tpu.memory_space<vmem>>, %arg5: memref<16x256xf32, #tpu.memory_space<vmem>>, %arg6: memref<256x32xf32, #tpu.memory_space<vmem>>, %arg7: memref<32x16xf32, #tpu.memory_space<vmem>>, %arg8: memref<32x16xf32, #tpu.memory_space<vmem>>, %arg9: memref<8x32xf32, #tpu.memory_space<vmem>>, %arg10: memref<32x16xf32, #tpu.memory_space<vmem>>, %arg11: memref<3x16xf32, #tpu.memory_space<vmem>>) attributes {dimension_semantics = [#tpu.dimension_semantics<arbitrary>], iteration_bounds = array<i64: 1>, scalar_prefetch = 0 : i64, scratch_operands = 0 : i64, tpu.core_type = #tpu.core_type<tc>, window_params = [{pipeline_mode = #tpu.pipeline_mode<synchronous>, transform_indices = @transform_0, window_bounds = array<i64: 32, 16>}, {pipeline_mode = #tpu.pipeline_mode<synchronous>, transform_indices = @transform_1, window_bounds = array<i64: 3, 16>}, {pipeline_mode = #tpu.pipeline_mode<synchronous>, transform_indices = @transform_2, window_bounds = array<i64: 3, 16>}, {pipeline_mode = #tpu.pipeline_mode<synchronous>, transform_indices = @transform_3, window_bounds = array<i64: 16, 256>}, {pipeline_mode = #tpu.pipeline_mode<synchronous>, transform_indices = @transform_4, window_bounds = array<i64: 16, 256>}, {pipeline_mode = #tpu.pipeline_mode<synchronous>, transform_indices = @transform_5, window_bounds = array<i64: 256, 32>}, {pipeline_mode = #tpu.pipeline_mode<synchronous>, transform_indices = @transform_6, window_bounds = array<i64: 32, 16>}, {pipeline_mode = #tpu.pipeline_mode<synchronous>, transform_indices = @transform_7, window_bounds = array<i64: 32, 16>}, {pipeline_mode = #tpu.pipeline_mode<synchronous>, transform_indices = @transform_8, window_bounds = array<i64: 8, 32>}, {pipeline_mode = #tpu.pipeline_mode<synchronous>, transform_indices = @transform_9, window_bounds = array<i64: 32, 16>}, {pipeline_mode = #tpu.pipeline_mode<synchronous>, transform_indices = @transform_10, window_bounds = array<i64: 3, 16>}]} {
    %c0 = arith.constant 0 : index
    %c0_0 = arith.constant 0 : index
    %0 = vector.load %arg1[%c0, %c0_0] : memref<32x16xf32, #tpu.memory_space<vmem>>, vector<32x16xf32>
    %c0_1 = arith.constant 0 : index
    %c0_2 = arith.constant 0 : index
    %1 = vector.load %arg2[%c0_1, %c0_2] : memref<3x16xf32, #tpu.memory_space<vmem>>, vector<3x16xf32>
    %c0_3 = arith.constant 0 : index
    %c0_4 = arith.constant 0 : index
    %2 = vector.load %arg4[%c0_3, %c0_4] : memref<16x256xf32, #tpu.memory_space<vmem>>, vector<16x256xf32>
    %c0_5 = arith.constant 0 : index
    %c0_6 = arith.constant 0 : index
    %3 = vector.load %arg5[%c0_5, %c0_6] : memref<16x256xf32, #tpu.memory_space<vmem>>, vector<16x256xf32>
    %c0_7 = arith.constant 0 : index
    %c0_8 = arith.constant 0 : index
    %4 = vector.load %arg6[%c0_7, %c0_8] : memref<256x32xf32, #tpu.memory_space<vmem>>, vector<256x32xf32>
    %c0_9 = arith.constant 0 : index
    %c0_10 = arith.constant 0 : index
    %5 = vector.load %arg8[%c0_9, %c0_10] : memref<32x16xf32, #tpu.memory_space<vmem>>, vector<32x16xf32>
    %c0_11 = arith.constant 0 : index
    %c0_12 = arith.constant 0 : index
    %6 = vector.load %arg9[%c0_11, %c0_12] : memref<8x32xf32, #tpu.memory_space<vmem>>, vector<8x32xf32>
    %7 = vector.extract_strided_slice %4 {offsets = [0, 0], sizes = [192, 32], strides = [1, 1]} : vector<256x32xf32> to vector<192x32xf32>
    %cst = arith.constant dense<0.000000e+00> : vector<192x16xf32>
    %8 = tpu.matmul %7, %0, %cst {dimension_numbers = #tpu.dot_dimension_numbers<[1], [0], [0], [1], [0, 0, 1, 1], [], []>} : vector<192x32xf32>, vector<32x16xf32>, vector<192x16xf32> -> vector<192x16xf32>
    %9 = vector.extract_strided_slice %8 {offsets = [0, 0], sizes = [64, 16], strides = [1, 1]} : vector<192x16xf32> to vector<64x16xf32>
    %cst_13 = arith.constant dense<0.000000e+00> : vector<64x256xf32>
    %10 = tpu.matmul %9, %2, %cst_13 {dimension_numbers = #tpu.dot_dimension_numbers<[1], [0], [0], [1], [0, 0, 1, 1], [], []>} : vector<64x16xf32>, vector<16x256xf32>, vector<64x256xf32> -> vector<64x256xf32>
    %11 = vector.extract_strided_slice %8 {offsets = [64, 0], sizes = [96, 16], strides = [1, 1]} : vector<192x16xf32> to vector<96x16xf32>
    %cst_14 = arith.constant dense<0.000000e+00> : vector<96x256xf32>
    %12 = tpu.matmul %11, %3, %cst_14 {dimension_numbers = #tpu.dot_dimension_numbers<[1], [0], [0], [1], [0, 0, 1, 1], [], []>} : vector<96x16xf32>, vector<16x256xf32>, vector<96x256xf32> -> vector<96x256xf32>
    %13 = vector.extract_strided_slice %10 {offsets = [0, 0], sizes = [32, 256], strides = [1, 1]} : vector<64x256xf32> to vector<32x256xf32>
    %14 = vector.extract_strided_slice %10 {offsets = [32, 0], sizes = [32, 256], strides = [1, 1]} : vector<64x256xf32> to vector<32x256xf32>
    %15 = vector.extract_strided_slice %12 {offsets = [0, 0], sizes = [32, 256], strides = [1, 1]} : vector<96x256xf32> to vector<32x256xf32>
    %16 = vector.extract_strided_slice %12 {offsets = [32, 0], sizes = [32, 256], strides = [1, 1]} : vector<96x256xf32> to vector<32x256xf32>
    %17 = vector.extract_strided_slice %12 {offsets = [64, 0], sizes = [32, 256], strides = [1, 1]} : vector<96x256xf32> to vector<32x256xf32>
    %18 = vector.extract_strided_slice %8 {offsets = [160, 0], sizes = [32, 16], strides = [1, 1]} : vector<192x16xf32> to vector<32x16xf32>
    %cst_15 = arith.constant dense<0.000000e+00> : vector<3x256xf32>
    %19 = tpu.matmul %1, %2, %cst_15 {dimension_numbers = #tpu.dot_dimension_numbers<[1], [0], [0], [1], [0, 0, 1, 1], [], []>} : vector<3x16xf32>, vector<16x256xf32>, vector<3x256xf32> -> vector<3x256xf32>
    %cst_16 = arith.constant dense<0.000000e+00> : vector<3x256xf32>
    %20 = tpu.matmul %1, %3, %cst_16 {dimension_numbers = #tpu.dot_dimension_numbers<[1], [0], [0], [1], [0, 0, 1, 1], [], []>} : vector<3x16xf32>, vector<16x256xf32>, vector<3x256xf32> -> vector<3x256xf32>
    %21 = arith.subf %19, %20 : vector<3x256xf32>
    %22 = arith.mulf %21, %21 : vector<3x256xf32>
    %cst_17 = arith.constant dense<0.000000e+00> : vector<256xf32>
    %23 = vector.multi_reduction <add>, %22, %cst_17 [0] : vector<3x256xf32> to vector<256xf32>
    %24 = vector.shape_cast %23 : vector<256xf32> to vector<1x256xf32>
    %25 = math.sqrt %24 : vector<1x256xf32>
    %cst_18 = arith.constant 1.000000e+01 : f32
    %26 = vector.broadcast %cst_18 : f32 to vector<1x256xf32>
    %27 = arith.cmpf ole, %25, %26 : vector<1x256xf32>
    %28 = vector.extract_strided_slice %5 {offsets = [0, 7], sizes = [16, 1], strides = [1, 1]} : vector<32x16xf32> to vector<16x1xf32>
    %29 = vector.extract_strided_slice %5 {offsets = [0, 8], sizes = [16, 1], strides = [1, 1]} : vector<32x16xf32> to vector<16x1xf32>
    %cst_19 = arith.constant 0.000000e+00 : f32
    %30 = vector.broadcast %cst_19 : f32 to vector<16x1xf32>
    %31 = arith.subf %30, %29 : vector<16x1xf32>
    %32 = vector.broadcast %25 : vector<1x256xf32> to vector<16x256xf32>
    %33 = vector.broadcast %28 : vector<16x1xf32> to vector<16x256xf32>
    %34 = arith.subf %32, %33 : vector<16x256xf32>
    %35 = arith.mulf %34, %34 : vector<16x256xf32>
    %36 = vector.broadcast %31 : vector<16x1xf32> to vector<16x256xf32>
    %37 = arith.mulf %36, %35 : vector<16x256xf32>
    %38 = math.exp %37 : vector<16x256xf32>
    %39 = arith.extui %27 : vector<1x256xi1> to vector<1x256xi32>
    %40 = arith.sitofp %39 : vector<1x256xi32> to vector<1x256xf32>
    %41 = vector.broadcast %40 : vector<1x256xf32> to vector<16x256xf32>
    %42 = arith.mulf %38, %41 : vector<16x256xf32>
    %43 = vector.extract_strided_slice %5 {offsets = [0, 0], sizes = [32, 1], strides = [1, 1]} : vector<32x16xf32> to vector<32x1xf32>
    %44 = vector.extract_strided_slice %5 {offsets = [0, 1], sizes = [32, 1], strides = [1, 1]} : vector<32x16xf32> to vector<32x1xf32>
    %45 = vector.extract_strided_slice %5 {offsets = [0, 2], sizes = [32, 1], strides = [1, 1]} : vector<32x16xf32> to vector<32x1xf32>
    %46 = arith.mulf %14, %16 : vector<32x256xf32>
    %cst_20 = arith.constant dense<0.000000e+00> : vector<256xf32>
    %47 = vector.multi_reduction <add>, %46, %cst_20 [0] : vector<32x256xf32> to vector<256xf32>
    %48 = vector.shape_cast %47 : vector<256xf32> to vector<1x256xf32>
    %c0_21 = arith.constant 0 : index
    %c0_22 = arith.constant 0 : index
    %49 = vector.load %arg7[%c0_21, %c0_22] : memref<32x16xf32, #tpu.memory_space<vmem>>, vector<32x16xf32>
    %cst_23 = arith.constant dense<0.000000e+00> : vector<32x256xf32>
    %50 = tpu.matmul %49, %42, %cst_23 {dimension_numbers = #tpu.dot_dimension_numbers<[1], [0], [0], [1], [0, 0, 1, 1], [], []>} : vector<32x16xf32>, vector<16x256xf32>, vector<32x256xf32> -> vector<32x256xf32>
    %51 = arith.addf %50, %13 : vector<32x256xf32>
    %52 = arith.addf %51, %15 : vector<32x256xf32>
    %53 = vector.broadcast %45 : vector<32x1xf32> to vector<32x256xf32>
    %54 = vector.broadcast %48 : vector<1x256xf32> to vector<32x256xf32>
    %55 = arith.mulf %53, %54 : vector<32x256xf32>
    %56 = arith.addf %52, %55 : vector<32x256xf32>
    %57 = vector.broadcast %43 : vector<32x1xf32> to vector<32x256xf32>
    %58 = arith.addf %56, %57 : vector<32x256xf32>
    %59 = arith.negf %58 : vector<32x256xf32>
    %60 = math.exp %59 : vector<32x256xf32>
    %cst_24 = arith.constant 1.000000e+00 : f32
    %61 = vector.broadcast %cst_24 : f32 to vector<32x256xf32>
    %62 = arith.addf %61, %60 : vector<32x256xf32>
    %63 = arith.divf %61, %62 : vector<32x256xf32>
    %64 = arith.mulf %58, %63 : vector<32x256xf32>
    %65 = vector.extract_strided_slice %4 {offsets = [192, 0], sizes = [32, 32], strides = [1, 1]} : vector<256x32xf32> to vector<32x32xf32>
    %cst_25 = arith.constant dense<0.000000e+00> : vector<32x256xf32>
    %66 = tpu.matmul %65, %64, %cst_25 {dimension_numbers = #tpu.dot_dimension_numbers<[1], [0], [0], [1], [0, 0, 1, 1], [], []>} : vector<32x32xf32>, vector<32x256xf32>, vector<32x256xf32> -> vector<32x256xf32>
    %67 = vector.broadcast %44 : vector<32x1xf32> to vector<32x256xf32>
    %68 = arith.addf %66, %67 : vector<32x256xf32>
    %69 = arith.negf %68 : vector<32x256xf32>
    %70 = math.exp %69 : vector<32x256xf32>
    %cst_26 = arith.constant 1.000000e+00 : f32
    %71 = vector.broadcast %cst_26 : f32 to vector<32x256xf32>
    %72 = arith.addf %71, %70 : vector<32x256xf32>
    %73 = arith.divf %71, %72 : vector<32x256xf32>
    %74 = arith.mulf %68, %73 : vector<32x256xf32>
    %75 = vector.extract_strided_slice %6 {offsets = [0, 0], sizes = [1, 32], strides = [1, 1]} : vector<8x32xf32> to vector<1x32xf32>
    %76 = vector.extract_strided_slice %6 {offsets = [2, 0], sizes = [1, 1], strides = [1, 1]} : vector<8x32xf32> to vector<1x1xf32>
    %cst_27 = arith.constant dense<0.000000e+00> : vector<1x256xf32>
    %77 = tpu.matmul %75, %74, %cst_27 {dimension_numbers = #tpu.dot_dimension_numbers<[1], [0], [0], [1], [0, 0, 1, 1], [], []>} : vector<1x32xf32>, vector<32x256xf32>, vector<1x256xf32> -> vector<1x256xf32>
    %78 = vector.broadcast %76 : vector<1x1xf32> to vector<1x256xf32>
    %79 = arith.addf %77, %78 : vector<1x256xf32>
    %cst_28 = arith.constant -1.000000e+30 : f32
    %80 = vector.broadcast %cst_28 : f32 to vector<1x256xf32>
    %81 = arith.select %27, %79, %80 : vector<1x256xi1>, vector<1x256xf32>
    %cst_29 = arith.constant 0.000000e+00 : f32
    %82 = vector.broadcast %cst_29 : f32 to vector<16x256xf32>
    %83 = arith.cmpf ogt, %2, %82 : vector<16x256xf32>
    %cst_30 = arith.constant 0xFF800000 : f32
    %84 = vector.shape_cast %81 : vector<1x256xf32> to vector<1x256xf32>
    %85 = vector.broadcast %84 : vector<1x256xf32> to vector<16x256xf32>
    %86 = vector.broadcast %cst_30 : f32 to vector<16x256xf32>
    %87 = arith.select %83, %85, %86 : vector<16x256xi1>, vector<16x256xf32>
    %cst_31 = arith.constant dense<0xFF800000> : vector<16xf32>
    %88 = vector.multi_reduction <maximumf>, %87, %cst_31 [1] : vector<16x256xf32> to vector<16xf32>
    %89 = vector.shape_cast %88 : vector<16xf32> to vector<16x1xf32>
    %90 = vector.broadcast %89 : vector<16x1xf32> to vector<16x256xf32>
    %91 = arith.subf %87, %90 : vector<16x256xf32>
    %cst_32 = arith.constant dense<0xFF800000> : vector<256xf32>
    %92 = vector.multi_reduction <maximumf>, %91, %cst_32 [0] : vector<16x256xf32> to vector<256xf32>
    %93 = vector.shape_cast %92 : vector<256xf32> to vector<1x256xf32>
    %94 = math.exp %93 : vector<1x256xf32>
    %cst_33 = arith.constant dense<0.000000e+00> : vector<1x16xf32>
    %95 = tpu.matmul %94, %2, %cst_33 {dimension_numbers = #tpu.dot_dimension_numbers<[1], [1], [0], [0], [0, 0, 1, 0], [], []>} : vector<1x256xf32>, vector<16x256xf32>, vector<1x16xf32> -> vector<1x16xf32>
    %cst_34 = arith.constant dense<0.000000e+00> : vector<1x256xf32>
    %96 = tpu.matmul %95, %2, %cst_34 {dimension_numbers = #tpu.dot_dimension_numbers<[1], [0], [0], [1], [0, 0, 1, 1], [], []>} : vector<1x16xf32>, vector<16x256xf32>, vector<1x256xf32> -> vector<1x256xf32>
    %97 = arith.divf %94, %96 : vector<1x256xf32>
    %98 = vector.broadcast %97 : vector<1x256xf32> to vector<32x256xf32>
    %99 = arith.mulf %17, %98 : vector<32x256xf32>
    %cst_35 = arith.constant dense<0.000000e+00> : vector<32x16xf32>
    %100 = tpu.matmul %99, %2, %cst_35 {dimension_numbers = #tpu.dot_dimension_numbers<[1], [1], [0], [0], [0, 0, 1, 0], [], []>} : vector<32x256xf32>, vector<16x256xf32>, vector<32x16xf32> -> vector<32x16xf32>
    %101 = vector.extract_strided_slice %5 {offsets = [0, 4], sizes = [32, 1], strides = [1, 1]} : vector<32x16xf32> to vector<32x1xf32>
    %102 = vector.extract_strided_slice %5 {offsets = [0, 5], sizes = [32, 1], strides = [1, 1]} : vector<32x16xf32> to vector<32x1xf32>
    %103 = vector.extract_strided_slice %5 {offsets = [0, 6], sizes = [32, 1], strides = [1, 1]} : vector<32x16xf32> to vector<32x1xf32>
    %104 = vector.extract_strided_slice %4 {offsets = [224, 0], sizes = [32, 32], strides = [1, 1]} : vector<256x32xf32> to vector<32x32xf32>
    %cst_36 = arith.constant dense<0.000000e+00> : vector<32x16xf32>
    %105 = tpu.matmul %104, %100, %cst_36 {dimension_numbers = #tpu.dot_dimension_numbers<[1], [0], [0], [1], [0, 0, 1, 1], [], []>} : vector<32x32xf32>, vector<32x16xf32>, vector<32x16xf32> -> vector<32x16xf32>
    %106 = vector.broadcast %101 : vector<32x1xf32> to vector<32x16xf32>
    %107 = arith.addf %105, %106 : vector<32x16xf32>
    %108 = arith.addf %0, %107 : vector<32x16xf32>
    %cst_37 = arith.constant dense<0.000000e+00> : vector<16xf32>
    %109 = vector.multi_reduction <add>, %108, %cst_37 [0] : vector<32x16xf32> to vector<16xf32>
    %110 = vector.shape_cast %109 : vector<16xf32> to vector<1x16xf32>
    %cst_38 = arith.constant 3.200000e+01 : f32
    %111 = vector.broadcast %cst_38 : f32 to vector<1x16xf32>
    %112 = arith.divf %110, %111 : vector<1x16xf32>
    %113 = vector.broadcast %112 : vector<1x16xf32> to vector<32x16xf32>
    %114 = arith.subf %108, %113 : vector<32x16xf32>
    %115 = arith.mulf %114, %114 : vector<32x16xf32>
    %cst_39 = arith.constant dense<0.000000e+00> : vector<16xf32>
    %116 = vector.multi_reduction <add>, %115, %cst_39 [0] : vector<32x16xf32> to vector<16xf32>
    %117 = vector.shape_cast %116 : vector<16xf32> to vector<1x16xf32>
    %cst_40 = arith.constant 3.200000e+01 : f32
    %118 = vector.broadcast %cst_40 : f32 to vector<1x16xf32>
    %119 = arith.divf %117, %118 : vector<1x16xf32>
    %120 = vector.broadcast %112 : vector<1x16xf32> to vector<32x16xf32>
    %121 = arith.subf %108, %120 : vector<32x16xf32>
    %cst_41 = arith.constant 9.99999974E-6 : f32
    %122 = vector.broadcast %cst_41 : f32 to vector<1x16xf32>
    %123 = arith.addf %119, %122 : vector<1x16xf32>
    %124 = math.rsqrt %123 : vector<1x16xf32>
    %125 = vector.broadcast %124 : vector<1x16xf32> to vector<32x16xf32>
    %126 = arith.mulf %121, %125 : vector<32x16xf32>
    %127 = vector.broadcast %102 : vector<32x1xf32> to vector<32x16xf32>
    %128 = arith.mulf %126, %127 : vector<32x16xf32>
    %129 = vector.broadcast %103 : vector<32x1xf32> to vector<32x16xf32>
    %130 = arith.addf %128, %129 : vector<32x16xf32>
    %c0_42 = arith.constant 0 : index
    %c0_43 = arith.constant 0 : index
    %131 = vector.load %arg10[%c0_42, %c0_43] : memref<32x16xf32, #tpu.memory_space<vmem>>, vector<32x16xf32>
    tpu.vector_store %arg10[%c0_42, %c0_43], %130 {strides = array<i32>} : memref<32x16xf32, #tpu.memory_space<vmem>>, vector<32x16xf32>,
    %132 = vector.extract_strided_slice %5 {offsets = [0, 3], sizes = [32, 1], strides = [1, 1]} : vector<32x16xf32> to vector<32x1xf32>
    %133 = vector.extract_strided_slice %6 {offsets = [1, 0], sizes = [1, 32], strides = [1, 1]} : vector<8x32xf32> to vector<1x32xf32>
    %134 = vector.extract_strided_slice %6 {offsets = [2, 1], sizes = [1, 1], strides = [1, 1]} : vector<8x32xf32> to vector<1x1xf32>
    %135 = vector.broadcast %132 : vector<32x1xf32> to vector<32x16xf32>
    %136 = arith.addf %18, %135 : vector<32x16xf32>
    %137 = arith.negf %136 : vector<32x16xf32>
    %138 = math.exp %137 : vector<32x16xf32>
    %cst_44 = arith.constant 1.000000e+00 : f32
    %139 = vector.broadcast %cst_44 : f32 to vector<32x16xf32>
    %140 = arith.addf %139, %138 : vector<32x16xf32>
    %141 = arith.divf %139, %140 : vector<32x16xf32>
    %142 = arith.mulf %136, %141 : vector<32x16xf32>
    %cst_45 = arith.constant dense<0.000000e+00> : vector<1x16xf32>
    %143 = tpu.matmul %133, %142, %cst_45 {dimension_numbers = #tpu.dot_dimension_numbers<[1], [0], [0], [1], [0, 0, 1, 1], [], []>} : vector<1x32xf32>, vector<32x16xf32>, vector<1x16xf32> -> vector<1x16xf32>
    %144 = vector.broadcast %134 : vector<1x1xf32> to vector<1x16xf32>
    %145 = arith.addf %143, %144 : vector<1x16xf32>
    %146 = arith.negf %145 : vector<1x16xf32>
    %147 = math.exp %146 : vector<1x16xf32>
    %cst_46 = arith.constant 1.000000e+00 : f32
    %148 = vector.broadcast %cst_46 : f32 to vector<1x16xf32>
    %149 = arith.addf %148, %147 : vector<1x16xf32>
    %150 = arith.divf %148, %149 : vector<1x16xf32>
    %151 = vector.broadcast %97 : vector<1x256xf32> to vector<3x256xf32>
    %152 = arith.mulf %21, %151 : vector<3x256xf32>
    %cst_47 = arith.constant dense<0.000000e+00> : vector<3x16xf32>
    %153 = tpu.matmul %152, %2, %cst_47 {dimension_numbers = #tpu.dot_dimension_numbers<[1], [1], [0], [0], [0, 0, 1, 0], [], []>} : vector<3x256xf32>, vector<16x256xf32>, vector<3x16xf32> -> vector<3x16xf32>
    %c0_48 = arith.constant 0 : index
    %c0_49 = arith.constant 0 : index
    %154 = vector.load %arg3[%c0_48, %c0_49] : memref<3x16xf32, #tpu.memory_space<vmem>>, vector<3x16xf32>
    %155 = vector.broadcast %150 : vector<1x16xf32> to vector<3x16xf32>
    %156 = arith.mulf %155, %153 : vector<3x16xf32>
    %157 = arith.addf %154, %156 : vector<3x16xf32>
    %c0_50 = arith.constant 0 : index
    %c0_51 = arith.constant 0 : index
    %158 = vector.load %arg11[%c0_50, %c0_51] : memref<3x16xf32, #tpu.memory_space<vmem>>, vector<3x16xf32>
    tpu.vector_store %arg11[%c0_50, %c0_51], %157 {strides = array<i32>} : memref<3x16xf32, #tpu.memory_space<vmem>>, vector<3x16xf32>,
    return
  }
  func.func @transform_0(%arg0: i32) -> (i32, i32) {
    %c0_i32 = arith.constant 0 : i32
    %c0_i32_0 = arith.constant 0 : i32
    %c0_i32_1 = arith.constant 0 : i32
    return %c0_i32, %c0_i32_0 : i32, i32
  }
  func.func @transform_1(%arg0: i32) -> (i32, i32) {
    %c0_i32 = arith.constant 0 : i32
    %c0_i32_0 = arith.constant 0 : i32
    %c0_i32_1 = arith.constant 0 : i32
    return %c0_i32, %c0_i32_0 : i32, i32
  }
  func.func @transform_2(%arg0: i32) -> (i32, i32) {
    %c0_i32 = arith.constant 0 : i32
    %c0_i32_0 = arith.constant 0 : i32
    %c0_i32_1 = arith.constant 0 : i32
    return %c0_i32, %c0_i32_0 : i32, i32
  }
  func.func @transform_3(%arg0: i32) -> (i32, i32) {
    %c0_i32 = arith.constant 0 : i32
    %c0_i32_0 = arith.constant 0 : i32
    %c0_i32_1 = arith.constant 0 : i32
    return %c0_i32, %c0_i32_0 : i32, i32
  }
  func.func @transform_4(%arg0: i32) -> (i32, i32) {
    %c0_i32 = arith.constant 0 : i32
    %c0_i32_0 = arith.constant 0 : i32
    %c0_i32_1 = arith.constant 0 : i32
    return %c0_i32, %c0_i32_0 : i32, i32
  }
  func.func @transform_5(%arg0: i32) -> (i32, i32) {
    %c0_i32 = arith.constant 0 : i32
    %c0_i32_0 = arith.constant 0 : i32
    %c0_i32_1 = arith.constant 0 : i32
    return %c0_i32, %c0_i32_0 : i32, i32
  }
  func.func @transform_6(%arg0: i32) -> (i32, i32) {
    %c0_i32 = arith.constant 0 : i32
    %c0_i32_0 = arith.constant 0 : i32
    %c0_i32_1 = arith.constant 0 : i32
    return %c0_i32, %c0_i32_0 : i32, i32
  }
  func.func @transform_7(%arg0: i32) -> (i32, i32) {
    %c0_i32 = arith.constant 0 : i32
    %c0_i32_0 = arith.constant 0 : i32
    %c0_i32_1 = arith.constant 0 : i32
    return %c0_i32, %c0_i32_0 : i32, i32
  }
  func.func @transform_8(%arg0: i32) -> (i32, i32) {
    %c0_i32 = arith.constant 0 : i32
    %c0_i32_0 = arith.constant 0 : i32
    %c0_i32_1 = arith.constant 0 : i32
    return %c0_i32, %c0_i32_0 : i32, i32
  }
  func.func @transform_9(%arg0: i32) -> (i32, i32) {
    %c0_i32 = arith.constant 0 : i32
    %c0_i32_0 = arith.constant 0 : i32
    %c0_i32_1 = arith.constant 0 : i32
    return %c0_i32, %c0_i32_0 : i32, i32
  }
  func.func @transform_10(%arg0: i32) -> (i32, i32) {
    %c0_i32 = arith.constant 0 : i32
    %c0_i32_0 = arith.constant 0 : i32
    %c0_i32_1 = arith.constant 0 : i32
    return %c0_i32, %c0_i32_0 : i32, i32
  }
}

</mosaic_0001>

<bundles_post_ra>
// kernel: tpu_custom_call.1
= control target key start
LH: loop header
LB: loop body
LE: loop exit
PB: predicated region body
PF: predicated region fallthrough
CT: control target
= control target key end

     0   :  { %s3215_s0 = inlined_call_operand.vmem [shape: f32[32,16], index: 0, kind: input, shape index: {}]   ;;  %s3216_s1 = inlined_call_operand.vmem [shape: f32[3,16], index: 1, kind: input, shape index: {}]   ;;  %s3217_s2 = inlined_call_operand.vmem [shape: f32[3,16], index: 2, kind: input, shape index: {}]   ;;  %s3218_s3 = inlined_call_operand.vmem [shape: f32[16,256], index: 3, kind: input, shape index: {}]   ;;  %s3219_s4 = inlined_call_operand.vmem [shape: f32[16,256], index: 4, kind: input, shape index: {}]   ;;  %s3220_s5 = inlined_call_operand.vmem [shape: f32[256,32], index: 5, kind: input, shape index: {}]   ;;  %s3221_s6 = inlined_call_operand.vmem [shape: f32[32,16], index: 6, kind: input, shape index: {}]   ;;  %s3222_s7 = inlined_call_operand.vmem [shape: f32[32,16], index: 7, kind: input, shape index: {}]   ;;  %s3223_s8 = inlined_call_operand.vmem [shape: f32[8,32], index: 8, kind: input, shape index: {}]   ;;  %s3224_s9 = inlined_call_operand.vmem [shape: f32[32,16], index: 9, kind: output, shape index: {0}]   ;;  %s3225_s10 = inlined_call_operand.hbm [shape: f32[3,16], index: 10, kind: output, shape index: {1}]  }
   0x1   :  { %v38_v0 = vld [vmem:[%s3215_s0 + $0x18] sm:$0xff]  ;;  %v37_v1 = vld [vmem:[%s3215_s0 + $0x10] sm:$0xff]  ;;  %v36_v2 = vld [vmem:[%s3215_s0 + $0x8] sm:$0xff] }
   0x2   :  { %170 = vmatpush.msra.mxu0 %v38_v0 }
   0x4   :  { %171 = vmatpush.msra.mxu0 %v37_v1 }
   0x5   :  { %16 = vsyncpa [#allocation3], 0  ;;  %v35_v3 = vld [vmem:[%s3215_s0] sm:$0xff]  ;;  %vm85_vm0 = vcmask 261120   ;;  %v49_v5 = vld [vmem:[%s3220_s5 + $0x8] sm:$0xff]  ;;  %vm247_vm1 = vcmask 130048  }
   0x6   :  { %172 = vmatpush.msra.mxu0 %v36_v2  ;;  %v48_v4 = vld [vmem:[%s3220_s5] sm:$0xff]  ;;  %v50_v6 = vld [vmem:[%s3220_s5 + $0x10] sm:$0xff]  ;;  %v51_v7 = vld [vmem:[%s3220_s5 + $0x18] sm:$0xff]  ;;  %v2189_v43 = vmov 7   ;;  %v2190_v45 = vmov 8   ;;  %v2191_v53 = vmov 2  }
   0x7   :  { %v52_v8 = vld [vmem:[%s3220_s5 + $0x20] sm:$0xff]  ;;  %v53_v9 = vld [vmem:[%s3220_s5 + $0x28] sm:$0xff]  ;;  %v54_v10 = vld [vmem:[%s3220_s5 + $0x30] sm:$0xff]  ;;  %2021 = vset.pattern.permute.xlu0 %v2189_v43  ;;  %2022 = vset.pattern.permute.xlu1 %v2190_v45  ;;  %vm583_vm2 = vcmask 1042432   ;;  %s1882_s29 = sshll.u32 %s3225_s10, 4  ;;  %s1883_s29 = int_to_ptr.hbm [resolvable:$true] %s1882_s29 }
   0x8   :  { %173 = vmatpush.msra.mxu0 %v35_v3  ;;  %v55_v11 = vld [vmem:[%s3220_s5 + $0x38] sm:$0xff]  ;;  %v56_v12 = vld [vmem:[%s3220_s5 + $0x40] sm:$0xff]  ;;  %v57_v13 = vld [vmem:[%s3220_s5 + $0x48] sm:$0xff]  ;;  %2023 = vset.pattern.permute.xlu2 %v2191_v53 }
   0x9   :  { %1893 = vmatmul.msk.f32.vlgmr.msra.gmra.mxu0 %vm85_vm0, %v48_v4  ;;  %v58_v14 = vld [vmem:[%s3220_s5 + $0x50] sm:$0xff]  ;;  %v59_v15 = vld [vmem:[%s3220_s5 + $0x58] sm:$0xff]  ;;  %v40_v18 = vld [vmem:[%s3218_s3] sm:$0xff] }
   0xa   :  { %v42_v16 = vld [vmem:[%s3218_s3 + $0x10] sm:$0xff]  ;;  %v43_v17 = vld [vmem:[%s3218_s3 + $0x18] sm:$0xff]  ;;  %v41_v19 = vld [vmem:[%s3218_s3 + $0x8] sm:$0xff] }
   0xb   :  { %286 = vmatpush.msra.mxu1 %v42_v16  ;;  %327 = vmatpush.msra.mxu2 %v43_v17  ;;  %v60_v20 = vld [vmem:[%s3220_s5 + $0x60] sm:$0xff]  ;;  %v61_v21 = vld [vmem:[%s3220_s5 + $0x68] sm:$0xff]  ;;  %v62_v22 = vld [vmem:[%s3220_s5 + $0x70] sm:$0xff] }
   0xc   :  { %v63_v23 = vld [vmem:[%s3220_s5 + $0x78] sm:$0xff]  ;;  %v46_v28 = vld [vmem:[%s3219_s4 + $0x10] sm:$0xff]  ;;  %v44_v30 = vld [vmem:[%s3219_s4] sm:$0xff] }
   0xd   :  { %287 = vmatpush.msra.mxu1 %v40_v18  ;;  %328 = vmatpush.msra.mxu2 %v41_v19  ;;  %v47_v29 = vld [vmem:[%s3219_s4 + $0x18] sm:$0xff]  ;;  %v45_v31 = vld [vmem:[%s3219_s4 + $0x8] sm:$0xff]  ;;  %v39_v36 = vld [vmem:[%s3216_s1] sm:$0x7]  ;;  %s2199_s1 = smov [#allocation2]  }
   0xe   :  { %404 = vmatpush.msra.mxu3 %v46_v28  ;;  %v64_v41 = vld [vmem:[%s3220_s5 + $0x80] sm:$0xff]  ;;  %v2394_v42 = vld [vmem:[%s3222_s7 + $0x8] sm:$0xff]  ;;  %v66_v49 = vld [vmem:[%s3220_s5 + $0x90] sm:$0xff]  ;;  %s1880_s30 = sshll.u32 %s2199_s1, 4  ;;  %s1881_s30 = int_to_ptr.vmem [resolvable:$true] %s1880_s30 }
   0xf   :  { %513 = vmatpush.msrb.mxu2 %v42_v16  ;;  %457 = vmatpush.msrb.mxu1 %v47_v29  ;;  %v65_v44 = vld [vmem:[%s3220_s5 + $0x88] sm:$0xff]  ;;  %v625_v46 = vsub.f32 0.0, %v2394_v42  ;;  %v2407_v48 = vld [vmem:[%s3222_s7] sm:$0xff]  ;;  %v67_v52 = vld [vmem:[%s3220_s5 + $0x98] sm:$0xff] }
  0x10   :  { %405 = vmatpush.msra.mxu3 %v44_v30  ;;  %633 = vperm.xlu0 %2021, %v2394_v42   ;;  %v624_v50 = vsub.f32 0.0, %v2407_v48  ;;  %v2427_v55 = vld [vmem:[%s3222_s7 + $0x18] sm:$0xff]  ;;  %v2437_v58 = vld [vmem:[%s3222_s7 + $0x10] sm:$0xff] }
  0x11   :  { %1894 = vmatmul.msk.f32.gmra.mxu0 %vm85_vm0, %v49_v5  ;;  %514 = vmatpush.msrb.mxu2 %v40_v18 }
  0x12   :  { %458 = vmatpush.msrb.mxu1 %v45_v31  ;;  %651 = vperm.xlu1 %2022, %v625_v46  }
  0x13   :  { %797 = vperm.xlu2 %2023, %v2427_v55  }
  0x18   :  { %628 = vperm.xlu0 %2021, %v2407_v48  }
  0x19   :  { %1895 = vmatmul.msk.f32.gmra.mxu0 %vm85_vm0, %v50_v6 }
  0x1a   :  { %646 = vperm.xlu1 %2022, %v624_v50  }
  0x1b   :  { %792 = vperm.xlu2 %2023, %v2437_v58  }
  0x20   :  { %2024 = vset.pattern.permute.xlu0 %v2191_v53 }
  0x21   :  { %1896 = vmatmul.msk.f32.gmra.mxu0 %vm85_vm0, %v51_v7  ;;  %787 = vperm.xlu0 %2024, %v2394_v42  }
  0x23   :  { %783 = vperm.xlu2 %2023, %v2407_v48  }
  0x29   :  { %1897 = vmatmul.msk.f32.gmra.mxu0 %vm85_vm0, %v52_v8 }
  0x31   :  { %1898 = vmatmul.msk.f32.gmra.mxu0 %vm85_vm0, %v53_v9 }
  0x39   :  { %1899 = vmatmul.msk.f32.gmra.mxu0 %vm85_vm0, %v54_v10 }
  0x41   :  { %1900 = vmatmul.msk.f32.gmra.mxu0 %vm85_vm0, %v55_v11 }
  0x49   :  { %1901 = vmatmul.msk.f32.gmra.mxu0 %vm85_vm0, %v56_v12 }
  0x51   :  { %1902 = vmatmul.msk.f32.gmra.mxu0 %vm85_vm0, %v57_v13 }
  0x59   :  { %1903 = vmatmul.msk.f32.gmra.mxu0 %vm85_vm0, %v58_v14 }
  0x61   :  { %1904 = vmatmul.msk.f32.gmra.mxu0 %vm85_vm0, %v59_v15 }
  0x69   :  { %1905 = vmatmul.msk.f32.gmra.mxu0 %vm85_vm0, %v60_v20 }
  0x71   :  { %1906 = vmatmul.msk.f32.gmra.mxu0 %vm85_vm0, %v61_v21 }
  0x79   :  { %1907 = vmatmul.msk.f32.gmra.mxu0 %vm85_vm0, %v62_v22 }
  0x81   :  { %1908 = vmatmul.msk.f32.gmra.mxu0 %vm85_vm0, %v63_v23 }
  0x86   :  { %v175_v24 = vpop.f32.mrf.mxu0 }
  0x87   :  { %1917 = vmatmul.msk.f32.vlgmr.msra.gmra.mxu1 %vm247_vm1, %v175_v24  ;;  %1925 = vmatmul.msk.f32.vlgmr.msra.gmra.mxu2 %vm247_vm1, %v175_v24 }
  0x88   :  { %533 = vmatpush.msra.mxu2 %v43_v17 }
  0x89   :  { %1909 = vmatmul.msk.f32.gmra.mxu0 %vm85_vm0, %v64_v41 }
  0x8a   :  { %534 = vmatpush.msra.mxu2 %v41_v19 }
  0x8e   :  { %v178_v25 = vpop.f32.mrf.mxu0 }
  0x8f   :  { %1918 = vmatmul.msk.f32.gmra.mxu1 %vm247_vm1, %v178_v25  ;;  %1926 = vmatmul.msk.f32.gmra.mxu2 %vm247_vm1, %v178_v25 }
  0x91   :  { %1910 = vmatmul.msk.f32.gmra.mxu0 %vm85_vm0, %v65_v44 }
  0x96   :  { %v181_v26 = vpop.f32.mrf.mxu0 }
  0x97   :  { %1919 = vmatmul.msk.f32.gmra.mxu1 %vm247_vm1, %v181_v26  ;;  %1927 = vmatmul.msk.f32.gmra.mxu2 %vm247_vm1, %v181_v26 }
  0x99   :  { %1911 = vmatmul.msk.f32.gmra.mxu0 %vm85_vm0, %v66_v49 }
  0x9e   :  { %v184_v27 = vpop.f32.mrf.mxu0 }
  0x9f   :  { %1920 = vmatmul.msk.f32.gmra.mxu1 %vm247_vm1, %v184_v27  ;;  %1928 = vmatmul.msk.f32.gmra.mxu2 %vm247_vm1, %v184_v27 }
  0xa1   :  { %1912 = vmatmul.msk.f32.gmra.mxu0 %vm85_vm0, %v67_v52 }
  0xa6   :  { %v187_v32 = vpop.f32.mrf.mxu0 }
  0xa7   :  { %1921 = vmatmul.msk.f32.gmra.mxu1 %vm247_vm1, %v187_v32  ;;  %1929 = vmatmul.msk.f32.gmra.mxu2 %vm247_vm1, %v187_v32 }
  0xae   :  { %v190_v33 = vpop.f32.mrf.mxu0 }
  0xaf   :  { %1922 = vmatmul.msk.f32.gmra.mxu1 %vm247_vm1, %v190_v33  ;;  %1930 = vmatmul.msk.f32.gmra.mxu2 %vm247_vm1, %v190_v33 }
  0xb6   :  { %v193_v34 = vpop.f32.mrf.mxu0 }
  0xb7   :  { %1923 = vmatmul.msk.f32.gmra.mxu1 %vm247_vm1, %v193_v34  ;;  %1931 = vmatmul.msk.f32.gmra.mxu2 %vm247_vm1, %v193_v34 }
  0xbe   :  { %v196_v35 = vpop.f32.mrf.mxu0 }
  0xbf   :  { %1924 = vmatmul.msk.f32.gmra.mxu1 %vm247_vm1, %v196_v35  ;;  %1932 = vmatmul.msk.f32.gmra.mxu2 %vm247_vm1, %v196_v35 }
  0xc6   :  { %v199_v37 = vpop.f32.mrf.mxu0 }
  0xc7   :  { %1933 = vmatmul.msk.f32.vlgmr.msra.gmra.mxu3 %vm247_vm1, %v199_v37  ;;  %1945 = vmatmul.msk.f32.vlgmr.msrb.gmra.mxu1 %vm247_vm1, %v199_v37 }
  0xc8   :  { %1957 = vmatmul.msk.f32.vlgmr.msrb.gmra.mxu2 %vm247_vm1, %v39_v36 }
  0xc9   :  { %553 = vmatpush.msrb.mxu2 %v46_v28 }
  0xcb   :  { %554 = vmatpush.msrb.mxu2 %v44_v30 }
  0xce   :  { %v202_v38 = vpop.f32.mrf.mxu0 }
  0xcf   :  { %1934 = vmatmul.msk.f32.gmra.mxu3 %vm247_vm1, %v202_v38  ;;  %1946 = vmatmul.msk.f32.gmra.mxu1 %vm247_vm1, %v202_v38 }
  0xd0   :  { %1958 = vmatmul.msk.f32.vlgmr.msra.gmra.mxu2 %vm247_vm1, %v39_v36 }
  0xd1   :  { %573 = vmatpush.msra.mxu2 %v47_v29 }
  0xd3   :  { %574 = vmatpush.msra.mxu2 %v45_v31 }
  0xd6   :  { %v205_v39 = vpop.f32.mrf.mxu0 }
  0xd7   :  { %1935 = vmatmul.msk.f32.gmra.mxu3 %vm247_vm1, %v205_v39  ;;  %1947 = vmatmul.msk.f32.gmra.mxu1 %vm247_vm1, %v205_v39 }
  0xd8   :  { %1959 = vmatmul.msk.f32.vlgmr.msrb.gmra.mxu2 %vm247_vm1, %v39_v36 }
  0xde   :  { %v208_v40 = vpop.f32.mrf.mxu0 }
  0xdf   :  { %1936 = vmatmul.msk.f32.gmra.mxu3 %vm247_vm1, %v208_v40  ;;  %1948 = vmatmul.msk.f32.gmra.mxu1 %vm247_vm1, %v208_v40 }
  0xe0   :  { %1960 = vmatmul.msk.f32.vlgmr.msra.gmra.mxu2 %vm247_vm1, %v39_v36 }
  0xe6   :  { %v211_v47 = vpop.f32.mrf.mxu0 }
  0xe7   :  { %1937 = vmatmul.msk.f32.gmra.mxu3 %vm247_vm1, %v211_v47  ;;  %1949 = vmatmul.msk.f32.gmra.mxu1 %vm247_vm1, %v211_v47 }
  0xee   :  { %v214_v51 = vpop.f32.mrf.mxu0 }
  0xef   :  { %1938 = vmatmul.msk.f32.gmra.mxu3 %vm247_vm1, %v214_v51  ;;  %1950 = vmatmul.msk.f32.gmra.mxu1 %vm247_vm1, %v214_v51 }
  0xf6   :  { %v217_v54 = vpop.f32.mrf.mxu0 }
  0xf7   :  { %1939 = vmatmul.msk.f32.gmra.mxu3 %vm247_vm1, %v217_v54  ;;  %1951 = vmatmul.msk.f32.gmra.mxu1 %vm247_vm1, %v217_v54 }
  0xfe   :  { %v220_v56 = vpop.f32.mrf.mxu0 }
  0xff   :  { %1940 = vmatmul.msk.f32.gmra.mxu3 %vm247_vm1, %v220_v56  ;;  %1952 = vmatmul.msk.f32.gmra.mxu1 %vm247_vm1, %v220_v56 }
 0x104   :  { %v2432_v57 = vpop.f32.mrf.mxu1 }
 0x106   :  { %v223_v22 = vpop.f32.mrf.mxu0 }
 0x107   :  { %1941 = vmatmul.msk.f32.gmra.mxu3 %vm247_vm1, %v223_v22  ;;  %1953 = vmatmul.msk.f32.gmra.mxu1 %vm247_vm1, %v223_v22 }
 0x10a   :  { %v2440_v59 = vpop.f32.mrf.mxu2 }
 0x10c   :  { %v2442_v60 = vpop.f32.mrf.mxu1 }
 0x10e   :  { %v226_v33 = vpop.f32.mrf.mxu0 }
 0x10f   :  { %1942 = vmatmul.msk.f32.gmra.mxu3 %vm247_vm1, %v226_v33  ;;  %1954 = vmatmul.msk.f32.gmra.mxu1 %vm247_vm1, %v226_v33 }
 0x112   :  { %v2445_v61 = vpop.f32.mrf.mxu2 }
 0x114   :  { %v2447_v62 = vpop.f32.mrf.mxu1 }
 0x116   :  { %v229_v47 = vpop.f32.mrf.mxu0 }
 0x117   :  { %1943 = vmatmul.msk.f32.gmra.mxu3 %vm247_vm1, %v229_v47  ;;  %1955 = vmatmul.msk.f32.gmra.mxu1 %vm247_vm1, %v229_v47 }
 0x11a   :  { %v2449_v63 = vpop.f32.mrf.mxu2 }
 0x11c   :  { %v2451_v0 = vpop.f32.mrf.mxu1 }
 0x11e   :  { %v232_v22 = vpop.f32.mrf.mxu0 }
 0x11f   :  { %1944 = vmatmul.msk.f32.gmra.mxu3 %vm247_vm1, %v232_v22  ;;  %1956 = vmatmul.msk.f32.gmra.mxu1 %vm247_vm1, %v232_v22 }
 0x122   :  { %v2453_v1 = vpop.f32.mrf.mxu2 }
 0x124   :  { %v301_v2 = vpop.f32.mrf.mxu1 }
 0x12a   :  { %v342_v3 = vpop.f32.mrf.mxu2 }
 0x12c   :  { %v304_v4 = vpop.f32.mrf.mxu1 }
 0x132   :  { %v345_v5 = vpop.f32.mrf.mxu2 }
 0x134   :  { %v2455_v6 = vpop.f32.mrf.mxu1 }
 0x13a   :  { %v348_v7 = vpop.f32.mrf.mxu2 }
 0x13c   :  { %v2457_v8 = vpop.f32.mrf.mxu1 }
 0x142   :  { %v2459_v9 = vpop.f32.mrf.mxu2 }
 0x144   :  { %v2461_v10 = vpop.f32.mrf.mxu1 }
 0x14a   :  { %v2463_v11 = vpop.f32.mrf.mxu3 }
 0x14b   :  { %v516_v12 = vpop.f32.mrf.mxu2 }
 0x14c   :  { %v2465_v13 = vpop.f32.mrf.mxu1 }
 0x152   :  { %v2467_v14 = vpop.f32.mrf.mxu3 }
 0x153   :  { %v536_v15 = vpop.f32.mrf.mxu2 }
 0x154   :  { %v2469_v16 = vpop.f32.mrf.mxu1 }
 0x15a   :  { %v2471_v17 = vpop.f32.mrf.mxu3 }
 0x15b   :  { %v556_v18 = vpop.f32.mrf.mxu2 }
 0x15c   :  { %v2473_v19 = vsub.f32 %v516_v12, %v556_v18  ;;  %v2475_v20 = vpop.f32.mrf.mxu1 }
 0x15e   :  { %v581_v21 = vmul.f32 %v2473_v19, %v2473_v19 }
 0x160   :  { %v584_v23 = vsel %vm583_vm2, %v581_v21, 0.0 }
 0x161   :  { %v585_v24 = vrot.slane %v584_v23, 4 }
 0x162   :  { %v2482_v25 = vpop.f32.mrf.mxu3 }
 0x163   :  { %v586_v26 = vadd.f32 %v585_v24, %v584_v23  ;;  %v576_v27 = vpop.f32.mrf.mxu2  ;;  %v652_v24 = vpop.permute.xlu1 %651 }
 0x164   :  { %v2484_v28 = vsub.f32 %v536_v15, %v576_v27  ;;  %v472_v29 = vpop.f32.mrf.mxu1 }
 0x165   :  { %v587_v30 = vrot.slane %v586_v26, 2  ;;  %v675_v43 = vmul.f32 %v472_v29, %v342_v3 }
 0x166   :  { %v582_v31 = vmul.f32 %v2484_v28, %v2484_v28 }
 0x167   :  { %v588_v32 = vadd.f32 %v587_v30, %v586_v26 }
 0x168   :  { %v591_v34 = vsel %vm583_vm2, %v582_v31, 0.0 }
 0x169   :  { %v589_v35 = vrot.slane %v588_v32, 1  ;;  %v592_v36 = vrot.slane %v591_v34, 4 }
 0x16a   :  { %v419_v37 = vpop.f32.mrf.mxu3 }
 0x16b   :  { %v590_v38 = vadd.f32 %v589_v35, %v588_v32  ;;  %v593_v39 = vadd.f32 %v592_v36, %v591_v34  ;;  %v674_v53 = vmul.f32 %v419_v37, %v301_v2 }
 0x16c   :  { %v475_v40 = vpop.f32.mrf.mxu1 }
 0x16d   :  { %v594_v41 = vrot.slane %v593_v39, 2  ;;  %v677_v44 = vmul.f32 %v475_v40, %v345_v5  ;;  %2042 = vrsqrt.f32 %v590_v38  ;;  %v634_v5 = vpop.permute.xlu0 %633  ;;  %vm605_vm3 = vcmp.eq.f32.partialorder %v590_v38, inf }
 0x16e   :  { %v608_v32 = vand.u32 2147483648, %v590_v38  ;;  %vm607_vm4 = vcmp.eq.f32.partialorder %v590_v38, 0.0 }
 0x16f   :  { %v595_v45 = vadd.f32 %v594_v41, %v593_v39  ;;  %v691_v46 = vadd.f32 %v677_v44, %v675_v43  ;;  %v647_v43 = vpop.permute.xlu1 %646 }
 0x171   :  { %v596_v49 = vrot.slane %v595_v45, 1 }
 0x172   :  { %v422_v50 = vpop.f32.mrf.mxu3 }
 0x173   :  { %v2043_v51 = vpop.eup %2042  ;;  %v597_v52 = vadd.f32 %v596_v49, %v595_v45  ;;  %v676_v54 = vmul.f32 %v422_v50, %v304_v4 }
 0x174   :  { %v478_v56 = vpop.f32.mrf.mxu1  ;;  %v599_v12 = vmul.f32 %v2043_v51, %v590_v38 }
 0x175   :  { %v2493_v15 = vadd.f32 %v676_v54, %v674_v53  ;;  %v679_v3 = vmul.f32 %v478_v56, %v348_v7  ;;  %2044 = vrsqrt.f32 %v597_v52  ;;  %v629_v34 = vpop.permute.xlu0 %628  ;;  %vm617_vm5 = vcmp.eq.f32.partialorder %v597_v52, inf }
 0x176   :  { %v600_v18 = vmul.f32 %v2043_v51, %v599_v12  ;;  %v620_v50 = vand.u32 2147483648, %v597_v52  ;;  %vm619_vm6 = vcmp.eq.f32.partialorder %v597_v52, 0.0 }
 0x177   :  { %v692_v21 = vadd.f32 %v691_v46, %v679_v3 }
 0x178   :  { %v601_v23 = vmul.f32 0.5, %v600_v18 }
 0x17a   :  { %v602_v26 = vsub.f32 1.5, %v601_v23 }
 0x17b   :  { %v2045_v27 = vpop.eup %2044 }
 0x17c   :  { %v603_v2 = vmul.f32 %v2043_v51, %v602_v26  ;;  %v611_v4 = vmul.f32 %v2045_v27, %v597_v52  ;;  %v481_v29 = vpop.f32.mrf.mxu1  ;;  %v2192_v51 = vmov 0   ;;  %v2193_v26 = vmov 0.0  }
 0x17d   :  { %v681_v30 = vmul.f32 %v481_v29, %v2459_v9  ;;  %2027 = vset.pattern.permute.xlu0 %v2192_v51  ;;  %2025 = vset.pattern.permute.xlu1 %v2192_v51 }
 0x17e   :  { %v604_v31 = vmul.f32 %v603_v2, %v590_v38  ;;  %v612_v7 = vmul.f32 %v2045_v27, %v611_v4  ;;  %817 = vperm.xlu0 %2027, %v2407_v48   ;;  %829 = vperm.xlu1 %2025, %v2427_v55  }
 0x17f   :  { %v2498_v33 = vadd.f32 %v692_v21, %v681_v30  ;;  %2026 = vset.pattern.permute.xlu2 %v2192_v51 }
 0x180   :  { %v606_v35 = vsel %vm605_vm3, %v590_v38, %v604_v31  ;;  %v613_v36 = vmul.f32 0.5, %v612_v7  ;;  %821 = vperm.xlu2 %2026, %v2394_v42   ;;  %v2523_v31 = vld [vmem:[%s3223_s8] sm:$0xff] }
 0x181   :  { %v2500_v37 = vsel %vm607_vm4, %v608_v32, %v606_v35 }
 0x182   :  { %v614_v39 = vsub.f32 1.5, %v613_v36  ;;  %v638_v40 = vsub.f32 %v2500_v37, %v634_v5  ;;  %v636_v41 = vsub.f32 %v2500_v37, %v629_v34  ;;  %vm622_vm7 = vcmp.le.f32.partialorder %v2500_v37, 10.0 }
 0x184   :  { %v615_v44 = vmul.f32 %v2045_v27, %v614_v39  ;;  %v642_v9 = vmul.f32 %v638_v40, %v638_v40  ;;  %v640_v45 = vmul.f32 %v636_v41, %v636_v41  ;;  %v1961_v27 = vsel %vm622_vm7, 1.0, %v2193_v26  ;;  %v701_v39 = vld [vmem:[%s3221_s6 + $0x8] sm:$0xff]  ;;  %v702_v40 = vld [vmem:[%s3221_s6 + $0x10] sm:$0xff]  ;;  %v703_v41 = vld [vmem:[%s3221_s6 + $0x18] sm:$0xff] }
 0x186   :  { %v616_v46 = vmul.f32 %v615_v44, %v597_v52  ;;  %v656_v47 = vmul.f32 %v652_v24, %v642_v9  ;;  %v654_v49 = vmul.f32 %v647_v43, %v640_v45  ;;  %825 = vperm.xlu1 %2025, %v2437_v58   ;;  %1248 = vperm.xlu0 %2027, %v2523_v31  }
 0x188   :  { %v618_v38 = vsel %vm617_vm5, %v597_v52, %v616_v46  ;;  %v662_v53 = vmul.f32 1.442695, %v656_v47  ;;  %v658_v54 = vmul.f32 1.442695, %v654_v49 }
 0x189   :  { %v2506_v56 = vsel %vm619_vm6, %v620_v50, %v618_v38  ;;  %v2551_v38 = vpop.permute.xlu2 %797 }
 0x18a   :  { %v639_v12 = vsub.f32 %v2506_v56, %v634_v5  ;;  %2046 = vpow2.f32 %v662_v53  ;;  %v637_v3 = vsub.f32 %v2506_v56, %v629_v34  ;;  %vm623_vm8 = vcmp.le.f32.partialorder %v2506_v56, 10.0  ;;  %v68_v56 = vld [vmem:[%s3220_s5 + $0xa0] sm:$0xff] }
 0x18b   :  { %2048 = vpow2.f32 %v658_v54  ;;  %v1962_v32 = vsel %vm623_vm8, 1.0, %v2193_v26  ;;  %1913 = vmatmul.msk.f32.gmra.mxu0 %vm85_vm0, %v68_v56 }
 0x18c   :  { %v643_v18 = vmul.f32 %v639_v12, %v639_v12  ;;  %v641_v21 = vmul.f32 %v637_v3, %v637_v3  ;;  %v694_v3 = vrot.slane %v2498_v33, 4 }
 0x18e   :  { %v657_v52 = vmul.f32 %v652_v24, %v643_v18  ;;  %v655_v22 = vmul.f32 %v647_v43, %v641_v21  ;;  %v700_v24 = vld [vmem:[%s3221_s6] sm:$0xff]  ;;  %v425_v43 = vpop.f32.mrf.mxu3 }
 0x18f   :  { %v678_v45 = vmul.f32 %v425_v43, %v2455_v6  ;;  %v695_v6 = vadd.f32 %v694_v3, %v2498_v33 }
 0x190   :  { %v2047_v23 = vpop.eup %2046  ;;  %v664_v2 = vmul.f32 1.442695, %v657_v52  ;;  %v660_v4 = vmul.f32 1.442695, %v655_v22  ;;  %v788_v52 = vpop.permute.xlu0 %787 }
 0x191   :  { %v2049_v5 = vpop.eup %2048  ;;  %v672_v29 = vmul.f32 %v2047_v23, %v1961_v27  ;;  %v683_v47 = vadd.f32 %v2493_v15, %v678_v45  ;;  %v2556_v21 = vpop.permute.xlu2 %792  ;;  %v696_v22 = vrot.slane %v695_v6, 2 }
 0x192   :  { %2050 = vpow2.f32 %v664_v2  ;;  %v670_v30 = vmul.f32 %v2049_v5, %v1961_v27 }
 0x193   :  { %2052 = vpow2.f32 %v660_v4  ;;  %730 = vmatpush.msrb.mxu2 %v672_v29  ;;  %v697_v4 = vadd.f32 %v696_v22, %v695_v6 }
 0x195   :  { %731 = vmatpush.msrb.mxu2 %v670_v30 }
 0x196   :  { %1963 = vmatmul.msk.f32.vlgmr.msrb.gmra.mxu2 %vm247_vm1, %v700_v24  ;;  %v428_v44 = vpop.f32.mrf.mxu3 }
 0x197   :  { %v680_v46 = vmul.f32 %v428_v44, %v2457_v8 }
 0x198   :  { %v2051_v7 = vpop.eup %2050 }
 0x199   :  { %v2053_v34 = vpop.eup %2052  ;;  %v673_v35 = vmul.f32 %v2051_v7, %v1962_v32  ;;  %v684_v49 = vadd.f32 %v683_v47, %v680_v46  ;;  %v784_v2 = vpop.permute.xlu2 %783  ;;  %v698_v7 = vrot.slane %v697_v4, 1 }
 0x19a   :  { %v671_v36 = vmul.f32 %v2053_v34, %v1962_v32 }
 0x19b   :  { %759 = vmatpush.msrb.mxu3 %v673_v35  ;;  %v685_v51 = vrot.slane %v684_v49, 4 }
 0x19d   :  { %760 = vmatpush.msrb.mxu3 %v671_v36  ;;  %v686_v53 = vadd.f32 %v685_v51, %v684_v49 }
 0x19e   :  { %1964 = vmatmul.msk.f32.gmra.mxu2 %vm247_vm1, %v701_v39  ;;  %1967 = vmatmul.msk.f32.vlgmr.msrb.gmra.mxu3 %vm247_vm1, %v700_v24  ;;  %v2544_v9 = vpop.f32.mrf.mxu3 }
 0x19f   :  { %v687_v54 = vrot.slane %v686_v53, 2 }
 0x1a1   :  { %v688_v18 = vadd.f32 %v687_v54, %v686_v53 }
 0x1a3   :  { %v689_v8 = vrot.slane %v688_v18, 1 }
 0x1a5   :  { %v690_v23 = vadd.f32 %v689_v8, %v688_v18 }
 0x1a6   :  { %1965 = vmatmul.msk.f32.gmra.mxu2 %vm247_vm1, %v702_v40  ;;  %1968 = vmatmul.msk.f32.gmra.mxu3 %vm247_vm1, %v701_v39  ;;  %v2549_v50 = vpop.f32.mrf.mxu3 }
 0x1a7   :  { %v800_v5 = vmul.f32 %v784_v2, %v690_v23  ;;  %v804_v18 = vmul.f32 %v2556_v21, %v690_v23 }
 0x1ae   :  { %1966 = vmatmul.msk.f32.gmra.mxu2 %vm247_vm1, %v703_v41  ;;  %1969 = vmatmul.msk.f32.gmra.mxu3 %vm247_vm1, %v702_v40  ;;  %v2553_v12 = vpop.f32.mrf.mxu3 }
 0x1b6   :  { %1970 = vmatmul.msk.f32.gmra.mxu3 %vm247_vm1, %v703_v41  ;;  %v2559_v15 = vpop.f32.mrf.mxu3  ;;  %v802_v41 = vmul.f32 %v788_v52, %v690_v23 }
 0x1da   :  { %v822_v43 = vpop.permute.xlu2 %821 }
 0x1f0   :  { %v818_v30 = vpop.permute.xlu0 %817  ;;  %v2568_v40 = vpop.permute.xlu1 %829 }
 0x1f8   :  { %v826_v8 = vpop.permute.xlu1 %825 }
 0x219   :  { %v733_v26 = vpop.f32.mrf.mxu2 }
 0x21a   :  { %v734_v27 = vadd.f32 %v733_v26, %v2432_v57  ;;  %v2570_v57 = vadd.f32 %v698_v7, %v697_v4 }
 0x21c   :  { %v774_v29 = vadd.f32 %v734_v27, %v2463_v11  ;;  %v801_v46 = vmul.f32 %v784_v2, %v2570_v57 }
 0x21e   :  { %v808_v24 = vadd.f32 %v800_v5, %v774_v29 }
 0x220   :  { %v2563_v32 = vadd.f32 %v818_v30, %v808_v24 }
 0x221   :  { %v736_v33 = vpop.f32.mrf.mxu2  ;;  %v762_v34 = vpop.f32.mrf.mxu3 }
 0x222   :  { %v1971_v35 = vmul.f32 -1.442695, %v2563_v32  ;;  %v737_v36 = vadd.f32 %v736_v33, %v2442_v60  ;;  %v763_v39 = vadd.f32 %v762_v34, %v2440_v59  ;;  %v806_v34 = vmul.f32 %v2551_v38, %v690_v23 }
 0x224   :  { %v776_v11 = vadd.f32 %v737_v36, %v2467_v14  ;;  %2054 = vpow2.f32 %v1971_v35  ;;  %v775_v44 = vadd.f32 %v763_v39, %v2461_v10  ;;  %v803_v14 = vmul.f32 %v788_v52, %v2570_v57 }
 0x225   :  { %v805_v35 = vmul.f32 %v2556_v21, %v2570_v57 }
 0x226   :  { %v810_v45 = vadd.f32 %v802_v41, %v776_v11  ;;  %v809_v51 = vadd.f32 %v801_v46, %v775_v44 }
 0x228   :  { %v2575_v47 = vadd.f32 %v822_v43, %v810_v45  ;;  %v2584_v27 = vadd.f32 %v818_v30, %v809_v51  ;;  %v807_v51 = vmul.f32 %v2551_v38, %v2570_v57 }
 0x229   :  { %v739_v49 = vpop.f32.mrf.mxu2  ;;  %v765_v60 = vpop.f32.mrf.mxu3 }
 0x22a   :  { %v1973_v59 = vmul.f32 -1.442695, %v2575_v47  ;;  %v740_v53 = vadd.f32 %v739_v49, %v2447_v62  ;;  %v766_v54 = vadd.f32 %v765_v60, %v2445_v61  ;;  %v2055_v3 = vpop.eup %2054  ;;  %v1972_v24 = vmul.f32 -1.442695, %v2584_v27 }
 0x22b   :  { %v2586_v2 = vadd.f32 1.0, %v2055_v3 }
 0x22c   :  { %2056 = vpow2.f32 %v1973_v59  ;;  %v778_v10 = vadd.f32 %v740_v53, %v2471_v17  ;;  %v777_v6 = vadd.f32 %v766_v54, %v2465_v13 }
 0x22d   :  { %2058 = vrcp.f32 %v2586_v2  ;;  %vm877_vm10 = vweird.f32 %v2586_v2 }
 0x22e   :  { %v811_v22 = vadd.f32 %v803_v14, %v777_v6  ;;  %v812_v26 = vadd.f32 %v804_v18, %v778_v10 }
 0x230   :  { %v2588_v62 = vadd.f32 %v826_v8, %v812_v26  ;;  %v2590_v61 = vadd.f32 %v822_v43, %v811_v22 }
 0x231   :  { %v742_v52 = vpop.f32.mrf.mxu2  ;;  %v768_v4 = vpop.f32.mrf.mxu3 }
 0x232   :  { %v2057_v5 = vpop.eup %2056  ;;  %v1975_v29 = vmul.f32 -1.442695, %v2588_v62  ;;  %v743_v17 = vadd.f32 %v742_v52, %v2451_v0  ;;  %v769_v13 = vadd.f32 %v768_v4, %v2449_v63  ;;  %v1974_v30 = vmul.f32 -1.442695, %v2590_v61 }
 0x233   :  { %v2598_v7 = vadd.f32 1.0, %v2057_v5  ;;  %v2609_v41 = vpop.eup %2058  ;;  %v881_v52 = vand.u32 2147483647, %v2586_v2  ;;  %v883_v4 = vand.u32 2147483648, %v2586_v2 }
 0x234   :  { %2060 = vpow2.f32 %v1975_v29  ;;  %v780_v33 = vadd.f32 %v743_v17, %v2482_v25  ;;  %v779_v0 = vadd.f32 %v769_v13, %v2469_v16  ;;  %v873_v45 = vmul.f32 %v2609_v41, %v2586_v2 }
 0x235   :  { %2062 = vpow2.f32 %v1972_v24  ;;  %vm878_vm9 = vweird.f32 %v2609_v41  ;;  %v911_v29 = vand.u32 2147483647, %v2598_v7  ;;  %vm2667_vm12 = vcmp.eq.f32.partialorder %v881_v52, 8.507059e+37 }
 0x236   :  { %v814_v36 = vadd.f32 %v806_v34, %v780_v33  ;;  %2064 = vpow2.f32 %v1974_v30  ;;  %v813_v39 = vadd.f32 %v805_v35, %v779_v0  ;;  %v874_v53 = vsub.f32 1.0, %v873_v45  ;;  %vm2663_vm11 = vmor %vm877_vm10, %vm878_vm9 }
 0x237   :  { %2066 = vrcp.f32 %v2598_v7  ;;  %v2194_v34 = vmov 1   ;;  %vm907_vm13 = vweird.f32 %v2598_v7  ;;  %vm2677_vm14 = vcmp.eq.f32.partialorder %v911_v29, 8.507059e+37 }
 0x238   :  { %v2607_v63 = vadd.f32 %v2568_v40, %v814_v36  ;;  %v2615_v44 = vadd.f32 %v826_v8, %v813_v39  ;;  %v875_v38 = vmul.f32 %v2609_v41, %v874_v53  ;;  %2028 = vset.pattern.permute.xlu1 %v2194_v34  ;;  %2029 = vset.pattern.permute.xlu2 %v2194_v34  ;;  %v884_v39 = vor.u32 1.1754944e-38, %v883_v4 }
 0x239   :  { %v771_v11 = vpop.f32.mrf.mxu3  ;;  %1013 = vperm.xlu1 %2028, %v2427_v55   ;;  %1009 = vperm.xlu2 %2029, %v2437_v58  }
 0x23a   :  { %v2061_v25 = vpop.eup %2060  ;;  %v1977_v23 = vmul.f32 -1.442695, %v2607_v63  ;;  %v772_v43 = vadd.f32 %v771_v11, %v2453_v1  ;;  %v1976_v1 = vmul.f32 -1.442695, %v2615_v44  ;;  %v876_v5 = vadd.f32 %v2609_v41, %v875_v38 }
 0x23b   :  { %v2613_v21 = vadd.f32 1.0, %v2061_v25  ;;  %v2063_v16 = vpop.eup %2062 }
 0x23c   :  { %2068 = vpow2.f32 %v1977_v23  ;;  %v2065_v46 = vpop.eup %2064  ;;  %v781_v60 = vadd.f32 %v772_v43, %v2475_v20  ;;  %v2626_v59 = vadd.f32 1.0, %v2063_v16  ;;  %v880_v11 = vsel %vm2663_vm11, %v2609_v41, %v876_v5 }
 0x23d   :  { %2070 = vrcp.f32 %v2613_v21  ;;  %v2620_v49 = vpop.eup %2066  ;;  %v2628_v14 = vadd.f32 1.0, %v2065_v46  ;;  %v913_v23 = vand.u32 2147483648, %v2598_v7  ;;  %vm937_vm2 = vweird.f32 %v2613_v21 }
 0x23e   :  { %v815_v54 = vadd.f32 %v807_v51, %v781_v60  ;;  %v903_v3 = vmul.f32 %v2620_v49, %v2598_v7  ;;  %2072 = vpow2.f32 %v1976_v1  ;;  %vm908_vm15 = vweird.f32 %v2620_v49 }
 0x23f   :  { %2074 = vrcp.f32 %v2626_v59  ;;  %v943_v46 = vand.u32 2147483648, %v2613_v21  ;;  %vm2701_vm4 = vmor %vm907_vm13, %vm908_vm15  ;;  %v885_v38 = vsel %vm2667_vm12, %v884_v39, %v880_v11  ;;  %vm892_vm13 = vweird.f32 %v2626_v59 }
 0x240   :  { %v2633_v10 = vadd.f32 %v2568_v40, %v815_v54  ;;  %2076 = vrcp.f32 %v2628_v14  ;;  %v904_v22 = vsub.f32 1.0, %v903_v3  ;;  %v941_v54 = vand.u32 2147483647, %v2613_v21 }
 0x241   :  { %v944_v52 = vor.u32 1.1754944e-38, %v943_v46  ;;  %1005 = vperm.xlu1 %2028, %v2394_v42   ;;  %1001 = vperm.xlu2 %2029, %v2407_v48   ;;  %v992_v42 = vmul.f32 %v885_v38, %v2563_v32 }
 0x242   :  { %v2069_v18 = vpop.eup %2068  ;;  %v1978_v8 = vmul.f32 -1.442695, %v2633_v10  ;;  %v905_v24 = vmul.f32 %v2620_v49, %v904_v22  ;;  %vm942_vm11 = vcmp.eq.f32.partialorder %v941_v54, 8.507059e+37 }
 0x243   :  { %v2635_v20 = vpop.eup %2070  ;;  %v2637_v6 = vadd.f32 1.0, %v2069_v18 }
 0x244   :  { %v933_v57 = vmul.f32 %v2635_v20, %v2613_v21  ;;  %v2073_v26 = vpop.eup %2072  ;;  %v906_v16 = vadd.f32 %v2620_v49, %v905_v24  ;;  %vm938_vm3 = vweird.f32 %v2635_v20 }
 0x245   :  { %2078 = vrcp.f32 %v2637_v6  ;;  %v2651_v17 = vadd.f32 1.0, %v2073_v26  ;;  %v2653_v13 = vpop.eup %2074  ;;  %v973_v60 = vand.u32 2147483648, %v2637_v6  ;;  %v971_v18 = vand.u32 2147483647, %v2637_v6  ;;  %vm2716_vm6 = vmor %vm937_vm2, %vm938_vm3 }
 0x246   :  { %v934_v40 = vsub.f32 1.0, %v933_v57  ;;  %2080 = vpow2.f32 %v1978_v8  ;;  %v2656_v30 = vpop.eup %2076  ;;  %v888_v51 = vmul.f32 %v2653_v13, %v2626_v59  ;;  %v910_v57 = vsel %vm2701_vm4, %v2620_v49, %v906_v16 }
 0x247   :  { %2082 = vrcp.f32 %v2651_v17  ;;  %v918_v45 = vmul.f32 %v2656_v30, %v2628_v14  ;;  %v914_v8 = vor.u32 1.1754944e-38, %v913_v23  ;;  %vm967_vm9 = vweird.f32 %v2637_v6 }
 0x248   :  { %v935_v33 = vmul.f32 %v2635_v20, %v934_v40  ;;  %v974_v4 = vor.u32 1.1754944e-38, %v973_v60  ;;  %v889_v21 = vsub.f32 1.0, %v888_v51  ;;  %vm972_vm12 = vcmp.eq.f32.partialorder %v971_v18, 8.507059e+37 }
 0x249   :  { %v919_v49 = vsub.f32 1.0, %v918_v45  ;;  %v915_v29 = vsel %vm2677_vm14, %v914_v8, %v910_v57  ;;  %vm923_vm14 = vweird.f32 %v2656_v30  ;;  %vm952_vm2 = vweird.f32 %v2651_v17 }
 0x24a   :  { %v936_v58 = vadd.f32 %v2635_v20, %v935_v33  ;;  %v994_v48 = vmul.f32 %v915_v29, %v2575_v47  ;;  %v956_v32 = vand.u32 2147483647, %v2651_v17  ;;  %v958_v47 = vand.u32 2147483648, %v2651_v17 }
 0x24b   :  { %v2079_v35 = vpop.eup %2078  ;;  %v928_v45 = vand.u32 2147483648, %v2628_v14 }
 0x24c   :  { %v2081_v2 = vpop.eup %2080  ;;  %v963_v43 = vmul.f32 %v2079_v35, %v2637_v6  ;;  %vm968_vm5 = vweird.f32 %v2079_v35  ;;  %v940_v40 = vsel %vm2716_vm6, %v2635_v20, %v936_v58  ;;  %vm893_vm6 = vweird.f32 %v2653_v13 }
 0x24d   :  { %v2686_v55 = vadd.f32 1.0, %v2081_v2  ;;  %v2697_v1 = vpop.eup %2082  ;;  %vm969_vm10 = vmor %vm967_vm9, %vm968_vm5  ;;  %v945_v33 = vsel %vm942_vm11, %v944_v52, %v940_v40  ;;  %v920_v2 = vmul.f32 %v2656_v30, %v919_v49  ;;  %vm922_vm5 = vweird.f32 %v2628_v14 }
 0x24e   :  { %v964_v41 = vsub.f32 1.0, %v963_v43  ;;  %v948_v22 = vmul.f32 %v2697_v1, %v2651_v17  ;;  %v996_v11 = vmul.f32 %v945_v33, %v2588_v62  ;;  %vm953_vm15 = vweird.f32 %v2697_v1  ;;  %v72_v17 = vld [vmem:[%s3220_s5 + $0xc0] sm:$0xff] }
 0x24f   :  { %2084 = vrcp.f32 %v2686_v55  ;;  %v988_v23 = vand.u32 2147483648, %v2686_v55  ;;  %v986_v16 = vand.u32 2147483647, %v2686_v55  ;;  %v921_v62 = vadd.f32 %v2656_v30, %v920_v2  ;;  %vm2748_vm4 = vmor %vm952_vm2, %vm953_vm15 }
 0x250   :  { %v965_v3 = vmul.f32 %v2079_v35, %v964_v41  ;;  %v949_v5 = vsub.f32 1.0, %v948_v22  ;;  %v926_v41 = vand.u32 2147483647, %v2628_v14  ;;  %vm982_vm9 = vweird.f32 %v2686_v55 }
 0x251   :  { %v989_v53 = vor.u32 1.1754944e-38, %v988_v23  ;;  %v959_v54 = vor.u32 1.1754944e-38, %v958_v47  ;;  %vm957_vm15 = vcmp.eq.f32.partialorder %v956_v32, 8.507059e+37  ;;  %v929_v8 = vor.u32 1.1754944e-38, %v928_v45 }
 0x252   :  { %v966_v26 = vadd.f32 %v2079_v35, %v965_v3  ;;  %v950_v6 = vmul.f32 %v2697_v1, %v949_v5  ;;  %v896_v3 = vand.u32 2147483647, %v2626_v59  ;;  %vm927_vm2 = vcmp.eq.f32.partialorder %v926_v41, 8.507059e+37  ;;  %v75_v5 = vld [vmem:[%s3220_s5 + $0xd8] sm:$0xff] }
 0x254   :  { %v970_v24 = vsel %vm969_vm10, %v2079_v35, %v966_v26  ;;  %v890_v35 = vmul.f32 %v2653_v13, %v889_v21  ;;  %vm2765_vm10 = vmor %vm922_vm5, %vm923_vm14 }
 0x255   :  { %v2085_v20 = vpop.eup %2084  ;;  %v975_v36 = vsel %vm972_vm12, %v974_v4, %v970_v24  ;;  %vm987_vm12 = vcmp.eq.f32.partialorder %v986_v16, 8.507059e+37  ;;  %vm894_vm14 = vmor %vm892_vm13, %vm893_vm6  ;;  %v2817_v4 = vld [vmem:[%s3218_s3 + $0x8] sm:$0xff] }
 0x256   :  { %v998_v0 = vmul.f32 %v975_v36, %v2607_v63  ;;  %v978_v39 = vmul.f32 %v2085_v20, %v2686_v55  ;;  %v951_v63 = vadd.f32 %v2697_v1, %v950_v6  ;;  %vm983_vm3 = vweird.f32 %v2085_v20 }
 0x257   :  { %v891_v14 = vadd.f32 %v2653_v13, %v890_v35  ;;  %vm984_vm11 = vmor %vm982_vm9, %vm983_vm3  ;;  %v898_v55 = vand.u32 2147483648, %v2626_v59  ;;  %vm897_vm3 = vcmp.eq.f32.partialorder %v896_v3, 8.507059e+37  ;;  %v73_v59 = vld [vmem:[%s3220_s5 + $0xc8] sm:$0xff] }
 0x258   :  { %1040 = vmatpush.msra.mxu2 %v998_v0  ;;  %v979_v25 = vsub.f32 1.0, %v978_v39  ;;  %v955_v60 = vsel %vm2748_vm4, %v2697_v1, %v951_v63  ;;  %v925_v1 = vsel %vm2765_vm10, %v2656_v30, %v921_v62 }
 0x259   :  { %v960_v57 = vsel %vm957_vm15, %v959_v54, %v955_v60  ;;  %v895_v22 = vsel %vm894_vm14, %v2653_v13, %v891_v14  ;;  %v930_v40 = vsel %vm927_vm2, %v929_v8, %v925_v1  ;;  %v899_v26 = vor.u32 1.1754944e-38, %v898_v55  ;;  %v2810_v13 = vld [vmem:[%s3218_s3 + $0x18] sm:$0xff] }
 0x25a   :  { %1041 = vmatpush.msra.mxu2 %v996_v11  ;;  %v980_v43 = vmul.f32 %v2085_v20, %v979_v25  ;;  %v997_v30 = vmul.f32 %v960_v57, %v2615_v44  ;;  %v995_v52 = vmul.f32 %v930_v40, %v2590_v61  ;;  %v2794_v44 = vld [vmem:[%s3218_s3 + $0x10] sm:$0xff] }
 0x25b   :  { %v900_v49 = vsel %vm897_vm3, %v899_v26, %v895_v22  ;;  %v74_v61 = vld [vmem:[%s3220_s5 + $0xd0] sm:$0xff] }
 0x25c   :  { %1042 = vmatpush.msra.mxu2 %v994_v48  ;;  %v981_v46 = vadd.f32 %v2085_v20, %v980_v43 }
 0x25e   :  { %1043 = vmatpush.msra.mxu2 %v992_v42  ;;  %v985_v18 = vsel %vm984_vm11, %v2085_v20, %v981_v46 }
 0x25f   :  { %1979 = vmatmul.msk.f32.vlgmr.msra.gmra.mxu2 %vm85_vm0, %v72_v17  ;;  %v990_v38 = vsel %vm987_vm12, %v989_v53, %v985_v18 }
 0x260   :  { %v999_v7 = vmul.f32 %v990_v38, %v2633_v10  ;;  %v993_v10 = vmul.f32 %v900_v49, %v2584_v27  ;;  %v2803_v27 = vld [vmem:[%s3218_s3] sm:$0xff] }
 0x262   :  { %1069 = vmatpush.msra.mxu3 %v999_v7 }
 0x264   :  { %1070 = vmatpush.msra.mxu3 %v997_v30 }
 0x266   :  { %1071 = vmatpush.msra.mxu3 %v995_v52 }
 0x267   :  { %1980 = vmatmul.msk.f32.gmra.mxu2 %vm85_vm0, %v73_v59 }
 0x268   :  { %1072 = vmatpush.msra.mxu3 %v993_v10 }
 0x269   :  { %1983 = vmatmul.msk.f32.vlgmr.msra.gmra.mxu3 %vm85_vm0, %v72_v17 }
 0x26a   :  { %1348 = vmatpush.xpose.msrb.mxu3 %v2794_v44 }
 0x26e   :  { %1349 = vmatpush.xpose.msrb.mxu3 %v2803_v27 }
 0x26f   :  { %1981 = vmatmul.msk.f32.gmra.mxu2 %vm85_vm0, %v74_v61 }
 0x271   :  { %1984 = vmatmul.msk.f32.gmra.mxu3 %vm85_vm0, %v73_v59 }
 0x272   :  { %1411 = vmatpush.msra.mxu3 %v2810_v13 }
 0x274   :  { %1412 = vmatpush.msra.mxu3 %v2817_v4 }
 0x277   :  { %1982 = vmatmul.msk.f32.gmra.mxu2 %vm85_vm0, %v75_v5 }
 0x279   :  { %1985 = vmatmul.msk.f32.gmra.mxu3 %vm85_vm0, %v74_v61 }
 0x281   :  { %1986 = vmatmul.msk.f32.gmra.mxu3 %vm85_vm0, %v75_v5 }
 0x293   :  { %v1010_v21 = vpop.permute.xlu2 %1009 }
 0x29b   :  { %v1002_v24 = vpop.permute.xlu2 %1001 }
 0x2ab   :  { %v1014_v29 = vpop.permute.xlu1 %1013 }
 0x2b3   :  { %v1006_v6 = vpop.permute.xlu1 %1005 }
 0x2e2   :  { %v1045_v20 = vpop.f32.mrf.mxu2 }
 0x2e3   :  { %v2826_v33 = vadd.f32 %v1045_v20, %v1002_v24 }
 0x2e5   :  { %v1987_v36 = vmul.f32 -1.442695, %v2826_v33 }
 0x2e7   :  { %2086 = vpow2.f32 %v1987_v36 }
 0x2ea   :  { %v1048_v0 = vpop.f32.mrf.mxu2 }
 0x2eb   :  { %v2829_v39 = vadd.f32 %v1048_v0, %v1006_v6 }
 0x2ec   :  { %v1074_v2 = vpop.f32.mrf.mxu3 }
 0x2ed   :  { %v1989_v42 = vmul.f32 -1.442695, %v2829_v39  ;;  %v2087_v48 = vpop.eup %2086  ;;  %v2832_v35 = vadd.f32 %v1074_v2, %v1002_v24 }
 0x2ee   :  { %v2836_v32 = vadd.f32 1.0, %v2087_v48 }
 0x2ef   :  { %2088 = vpow2.f32 %v1989_v42  ;;  %v1988_v16 = vmul.f32 -1.442695, %v2832_v35 }
 0x2f0   :  { %v1127_v24 = vand.u32 2147483647, %v2836_v32  ;;  %vm1123_vm13 = vweird.f32 %v2836_v32  ;;  %v1129_v0 = vand.u32 2147483648, %v2836_v32 }
 0x2f2   :  { %v1051_v11 = vpop.f32.mrf.mxu2  ;;  %vm2905_vm10 = vcmp.eq.f32.partialorder %v1127_v24, 8.507059e+37 }
 0x2f3   :  { %v2834_v25 = vadd.f32 %v1051_v11, %v1010_v21 }
 0x2f4   :  { %v1077_v63 = vpop.f32.mrf.mxu3 }
 0x2f5   :  { %v2089_v23 = vpop.eup %2088  ;;  %v1991_v47 = vmul.f32 -1.442695, %v2834_v25  ;;  %v2839_v43 = vadd.f32 %v1077_v63, %v1006_v6 }
 0x2f6   :  { %v2843_v58 = vadd.f32 1.0, %v2089_v23 }
 0x2f7   :  { %2090 = vpow2.f32 %v1991_v47  ;;  %v1990_v62 = vmul.f32 -1.442695, %v2839_v43 }
 0x2f8   :  { %2092 = vrcp.f32 %v2836_v32  ;;  %vm1153_vm5 = vweird.f32 %v2843_v58  ;;  %v1157_v42 = vand.u32 2147483647, %v2843_v58  ;;  %v1159_v11 = vand.u32 2147483648, %v2843_v58 }
 0x2f9   :  { %2094 = vpow2.f32 %v1988_v16 }
 0x2fa   :  { %v1054_v41 = vpop.f32.mrf.mxu2  ;;  %2096 = vpow2.f32 %v1990_v62  ;;  %vm2923_vm14 = vcmp.eq.f32.partialorder %v1157_v42, 8.507059e+37 }
 0x2fb   :  { %2098 = vrcp.f32 %v2843_v58  ;;  %v2847_v45 = vadd.f32 %v1054_v41, %v1014_v29 }
 0x2fc   :  { %v1080_v17 = vpop.f32.mrf.mxu3 }
 0x2fd   :  { %v2091_v46 = vpop.eup %2090  ;;  %v2849_v60 = vadd.f32 %v1080_v17, %v1010_v21  ;;  %v1993_v14 = vmul.f32 -1.442695, %v2847_v45 }
 0x2fe   :  { %v2851_v51 = vadd.f32 1.0, %v2091_v46  ;;  %v2854_v53 = vpop.eup %2092  ;;  %v1130_v46 = vor.u32 1.1754944e-38, %v1129_v0 }
 0x2ff   :  { %v2095_v54 = vpop.eup %2094  ;;  %v1992_v3 = vmul.f32 -1.442695, %v2849_v60  ;;  %v1119_v38 = vmul.f32 %v2854_v53, %v2836_v32  ;;  %vm1124_vm4 = vweird.f32 %v2854_v53 }
 0x300   :  { %2100 = vrcp.f32 %v2851_v51  ;;  %v2097_v55 = vpop.eup %2096  ;;  %v2860_v1 = vadd.f32 1.0, %v2095_v54  ;;  %vm2901_vm9 = vmor %vm1123_vm13, %vm1124_vm4  ;;  %vm1183_vm12 = vweird.f32 %v2851_v51 }
 0x301   :  { %v2858_v18 = vpop.eup %2098  ;;  %2102 = vpow2.f32 %v1993_v14  ;;  %v2864_v57 = vadd.f32 1.0, %v2097_v55  ;;  %v1120_v49 = vsub.f32 1.0, %v1119_v38  ;;  %v1187_v55 = vand.u32 2147483647, %v2851_v51 }
 0x302   :  { %2104 = vpow2.f32 %v1992_v3  ;;  %v1149_v7 = vmul.f32 %v2858_v18, %v2843_v58  ;;  %vm1154_vm6 = vweird.f32 %v2858_v18  ;;  %v1189_v38 = vand.u32 2147483648, %v2851_v51 }
 0x303   :  { %2106 = vrcp.f32 %v2860_v1  ;;  %v1121_v5 = vmul.f32 %v2854_v53, %v1120_v49  ;;  %vm2916_vm11 = vmor %vm1153_vm5, %vm1154_vm6  ;;  %vm2950_vm13 = vcmp.eq.f32.partialorder %v1187_v55, 8.507059e+37 }
 0x304   :  { %v1083_v8 = vpop.f32.mrf.mxu3  ;;  %2108 = vrcp.f32 %v2864_v57  ;;  %v1150_v59 = vsub.f32 1.0, %v1149_v7  ;;  %v1190_v0 = vor.u32 1.1754944e-38, %v1189_v38 }
 0x305   :  { %v2868_v22 = vadd.f32 %v1083_v8, %v1014_v29  ;;  %v1122_v48 = vadd.f32 %v2854_v53, %v1121_v5  ;;  %v1160_v8 = vor.u32 1.1754944e-38, %v1159_v11 }
 0x306   :  { %v2870_v40 = vpop.eup %2100  ;;  %v1151_v20 = vmul.f32 %v2858_v18, %v1150_v59 }
 0x307   :  { %v1994_v26 = vmul.f32 -1.442695, %v2868_v22  ;;  %v2103_v30 = vpop.eup %2102  ;;  %v1179_v52 = vmul.f32 %v2870_v40, %v2851_v51  ;;  %vm1184_vm15 = vweird.f32 %v2870_v40  ;;  %v1126_v58 = vsel %vm2901_vm9, %v2854_v53, %v1122_v48 }
 0x308   :  { %v2877_v10 = vadd.f32 1.0, %v2103_v30  ;;  %v2105_v61 = vpop.eup %2104  ;;  %v1152_v62 = vadd.f32 %v2858_v18, %v1151_v20  ;;  %vm2939_vm2 = vmor %vm1183_vm12, %vm1184_vm15  ;;  %v1131_v24 = vsel %vm2905_vm10, %v1130_v46, %v1126_v58  ;;  %vm1138_vm9 = vweird.f32 %v2860_v1 }
 0x309   :  { %2110 = vpow2.f32 %v1994_v26  ;;  %v1180_v21 = vsub.f32 1.0, %v1179_v52  ;;  %v2881_v29 = vpop.eup %2106  ;;  %v2885_v36 = vadd.f32 1.0, %v2105_v61 }
 0x30a   :  { %2112 = vrcp.f32 %v2877_v10  ;;  %v2887_v6 = vpop.eup %2108  ;;  %v1134_v41 = vmul.f32 %v2881_v29, %v2860_v1  ;;  %v1156_v49 = vsel %vm2916_vm11, %v2858_v18, %v1152_v62  ;;  %v1219_v61 = vand.u32 2147483648, %v2877_v10 }
 0x30b   :  { %2114 = vrcp.f32 %v2885_v36  ;;  %v1181_v63 = vmul.f32 %v2870_v40, %v1180_v21  ;;  %v1164_v17 = vmul.f32 %v2887_v6, %v2864_v57  ;;  %v1217_v53 = vand.u32 2147483647, %v2877_v10 }
 0x30c   :  { %v1135_v52 = vsub.f32 1.0, %v1134_v41  ;;  %v1142_v18 = vand.u32 2147483647, %v2860_v1  ;;  %vm1139_vm4 = vweird.f32 %v2881_v29  ;;  %vm1213_vm5 = vweird.f32 %v2877_v10 }
 0x30d   :  { %v1182_v7 = vadd.f32 %v2870_v40, %v1181_v63  ;;  %v1165_v51 = vsub.f32 1.0, %v1164_v17  ;;  %v1161_v63 = vsel %vm2923_vm14, %v1160_v8, %v1156_v49  ;;  %v1220_v62 = vor.u32 1.1754944e-38, %v1219_v61 }
 0x30e   :  { %v1136_v32 = vmul.f32 %v2881_v29, %v1135_v52  ;;  %vm1218_vm10 = vcmp.eq.f32.partialorder %v1217_v53, 8.507059e+37  ;;  %vm1169_vm11 = vweird.f32 %v2887_v6  ;;  %vm1198_vm12 = vweird.f32 %v2885_v36 }
 0x30f   :  { %v2111_v2 = vpop.eup %2110  ;;  %v1166_v16 = vmul.f32 %v2887_v6, %v1165_v51  ;;  %v1202_v55 = vand.u32 2147483647, %v2885_v36  ;;  %v1204_v38 = vand.u32 2147483648, %v2885_v36  ;;  %v1172_v49 = vand.u32 2147483647, %v2864_v57 }
 0x310   :  { %v2899_v23 = vadd.f32 1.0, %v2111_v2  ;;  %v2113_v47 = vpop.eup %2112  ;;  %v1186_v2 = vsel %vm2939_vm2, %v2870_v40, %v1182_v7  ;;  %vm1168_vm2 = vweird.f32 %v2864_v57  ;;  %v1174_v52 = vand.u32 2147483648, %v2864_v57 }
 0x311   :  { %v1209_v54 = vmul.f32 %v2113_v47, %v2877_v10  ;;  %v2934_v30 = vpop.eup %2114  ;;  %vm1214_vm3 = vweird.f32 %v2113_v47  ;;  %v1191_v17 = vsel %vm2950_vm13, %v1190_v0, %v1186_v2  ;;  %v1167_v3 = vadd.f32 %v2887_v6, %v1166_v16  ;;  %vm2995_vm13 = vmor %vm1168_vm2, %vm1169_vm11 }
 0x312   :  { %2116 = vrcp.f32 %v2899_v23  ;;  %v1194_v21 = vmul.f32 %v2934_v30, %v2885_v36  ;;  %vm1215_vm6 = vmor %vm1213_vm5, %vm1214_vm3  ;;  %vm1199_vm15 = vweird.f32 %v2934_v30  ;;  %v1234_v58 = vand.u32 2147483648, %v2899_v23 }
 0x313   :  { %v1210_v26 = vsub.f32 1.0, %v1209_v54  ;;  %v1242_v8 = vmul.f32 %v1191_v17, %v2834_v25  ;;  %vm2988_vm3 = vmor %vm1198_vm12, %vm1199_vm15  ;;  %v1240_v25 = vmul.f32 %v1161_v63, %v2829_v39  ;;  %vm1228_vm5 = vweird.f32 %v2899_v23 }
 0x314   :  { %v1195_v48 = vsub.f32 1.0, %v1194_v21  ;;  %v1238_v36 = vmul.f32 %v1131_v24, %v2826_v33  ;;  %v1205_v53 = vor.u32 1.1754944e-38, %v1204_v38  ;;  %v1235_v39 = vor.u32 1.1754944e-38, %v1234_v58  ;;  %vm3013_vm12 = vmor %vm1138_vm9, %vm1139_vm4  ;;  %v3061_v38 = vld [vmem:[%s3222_s7 + $0x18] sm:$0xff] }
 0x315   :  { %v1211_v5 = vmul.f32 %v2113_v47, %v1210_v26  ;;  %v1232_v26 = vand.u32 2147483647, %v2899_v23  ;;  %v1171_v21 = vsel %vm2995_vm13, %v2887_v6, %v1167_v3  ;;  %vm1173_vm15 = vcmp.eq.f32.partialorder %v1172_v49, 8.507059e+37 }
 0x316   :  { %v1196_v40 = vmul.f32 %v2934_v30, %v1195_v48  ;;  %vm1143_vm4 = vcmp.eq.f32.partialorder %v1142_v18, 8.507059e+37  ;;  %v1249_v18 = vpop.permute.xlu0 %1248  ;;  %vm1298_vm9 = vcmp.gt.f32.partialorder %v2794_v44, 0.0  ;;  %vm1296_vm2 = vcmp.gt.f32.partialorder %v2803_v27, 0.0 }
 0x317   :  { %v1212_v42 = vadd.f32 %v2113_v47, %v1211_v5  ;;  %v1144_v5 = vand.u32 2147483648, %v2860_v1  ;;  %vm1233_vm11 = vcmp.eq.f32.partialorder %v1232_v26, 8.507059e+37  ;;  %v1250_v63 = vrot.slane %v1249_v18, 2 }
 0x318   :  { %v2117_v11 = vpop.eup %2116  ;;  %v1197_v54 = vadd.f32 %v2934_v30, %v1196_v40 }
 0x319   :  { %v1216_v41 = vsel %vm1215_vm6, %v2113_v47, %v1212_v42  ;;  %v1224_v10 = vmul.f32 %v2117_v11, %v2899_v23  ;;  %vm1229_vm14 = vweird.f32 %v2117_v11  ;;  %v1175_v23 = vor.u32 1.1754944e-38, %v1174_v52  ;;  %v69_v52 = vld [vmem:[%s3220_s5 + $0xa8] sm:$0xff] }
 0x31a   :  { %v1221_v46 = vsel %vm1218_vm10, %v1220_v62, %v1216_v41  ;;  %v1201_v57 = vsel %vm2988_vm3, %v2934_v30, %v1197_v54  ;;  %vm1230_vm6 = vmor %vm1228_vm5, %vm1229_vm14  ;;  %vm1203_vm10 = vcmp.eq.f32.partialorder %v1202_v55, 8.507059e+37  ;;  %v1145_v2 = vor.u32 1.1754944e-38, %v1144_v5  ;;  %1914 = vmatmul.msk.f32.gmra.mxu0 %vm85_vm0, %v69_v52 }
 0x31b   :  { %v1244_v14 = vmul.f32 %v1221_v46, %v2847_v45  ;;  %v1225_v47 = vsub.f32 1.0, %v1224_v10  ;;  %v1137_v45 = vadd.f32 %v2881_v29, %v1136_v32  ;;  %v1206_v30 = vsel %vm1203_vm10, %v1205_v53, %v1201_v57 }
 0x31c   :  { %v1176_v42 = vsel %vm1173_vm15, %v1175_v23, %v1171_v21  ;;  %v1243_v48 = vmul.f32 %v1206_v30, %v2849_v60  ;;  %vm1299_vm14 = vcmp.gt.f32.partialorder %v2810_v13, 0.0  ;;  %vm1297_vm3 = vcmp.gt.f32.partialorder %v2817_v4, 0.0  ;;  %v70_v21 = vld [vmem:[%s3220_s5 + $0xb0] sm:$0xff] }
 0x31d   :  { %v1226_v7 = vmul.f32 %v2117_v11, %v1225_v47  ;;  %1266 = vmatpush.msra.mxu1 %v1244_v14  ;;  %v1141_v0 = vsel %vm3013_vm12, %v2881_v29, %v1137_v45  ;;  %v1241_v29 = vmul.f32 %v1176_v42, %v2839_v43  ;;  %v2195_v55 = vmov 3  }
 0x31e   :  { %2030 = vset.pattern.permute.xlu0 %v2195_v55 }
 0x31f   :  { %v1227_v61 = vadd.f32 %v2117_v11, %v1226_v7  ;;  %1267 = vmatpush.msra.mxu1 %v1242_v8  ;;  %1691 = vperm.xlu0 %2030, %v3061_v38  }
 0x321   :  { %v1231_v20 = vsel %vm1230_vm6, %v2117_v11, %v1227_v61  ;;  %1268 = vmatpush.msra.mxu1 %v1240_v25  ;;  %v1146_v11 = vsel %vm1143_vm4, %v1145_v2, %v1141_v0  ;;  %v3071_v61 = vld [vmem:[%s3222_s7 + $0x10] sm:$0xff] }
 0x322   :  { %v1236_v24 = vsel %vm1233_vm11, %v1235_v39, %v1231_v20  ;;  %1915 = vmatmul.msk.f32.gmra.mxu0 %vm85_vm0, %v70_v21 }
 0x323   :  { %v1245_v6 = vmul.f32 %v1236_v24, %v2868_v22  ;;  %1269 = vmatpush.msra.mxu1 %v1238_v36  ;;  %v1239_v22 = vmul.f32 %v1146_v11, %v2832_v35  ;;  %v3038_v35 = vpop.f32.mrf.mxu1  ;;  %v3081_v24 = vld [vmem:[%s3222_s7 + $0x8] sm:$0xff]  ;;  %v3091_v11 = vld [vmem:[%s3222_s7] sm:$0xff] }
 0x324   :  { %1995 = vmatmul.msk.f32.vlgmr.msra.gmra.mxu1 %vm85_vm0, %v2523_v31 }
 0x325   :  { %1286 = vmatpush.msrb.mxu2 %v1245_v6  ;;  %1368 = vmatpush.xpose.msrb.mxu1 %v2810_v13 }
 0x327   :  { %1287 = vmatpush.msrb.mxu2 %v1243_v48  ;;  %1687 = vperm.xlu0 %2030, %v3071_v61   ;;  %v71_v48 = vld [vmem:[%s3220_s5 + $0xb8] sm:$0xff] }
 0x329   :  { %1288 = vmatpush.msrb.mxu2 %v1241_v29  ;;  %1369 = vmatpush.xpose.msrb.mxu1 %v2817_v4 }
 0x32a   :  { %1916 = vmatmul.msk.f32.gmra.mxu0 %vm85_vm0, %v71_v48 }
 0x32b   :  { %1289 = vmatpush.msrb.mxu2 %v1239_v22  ;;  %v3040_v43 = vpop.f32.mrf.mxu1 }
 0x32c   :  { %1996 = vmatmul.msk.f32.vlgmr.msrb.gmra.mxu2 %vm85_vm0, %v2523_v31 }
 0x32d   :  { %1471 = vmatpush.xpose.msra.mxu1 %v2794_v44  ;;  %1391 = vmatpush.msra.mxu2 %v2794_v44 }
 0x32f   :  { %1392 = vmatpush.msra.mxu2 %v2803_v27  ;;  %1683 = vperm.xlu0 %2030, %v3081_v24  }
 0x331   :  { %1472 = vmatpush.xpose.msra.mxu1 %v2803_v27  ;;  %1500 = vmatpush.xpose.msrb.mxu2 %v2810_v13 }
 0x333   :  { %v3042_v60 = vpop.f32.mrf.mxu1 }
 0x335   :  { %1501 = vmatpush.xpose.msrb.mxu2 %v2817_v4 }
 0x337   :  { %1679 = vperm.xlu0 %2030, %v3091_v11  }
 0x33b   :  { %v3044_v1 = vpop.f32.mrf.mxu1 }
 0x3a1   :  { %v1271_v31 = vpop.f32.mrf.mxu1 }
 0x3a2   :  { %v1272_v32 = vadd.f32 %v1271_v31, %v1250_v63 }
 0x3a4   :  { %v1294_v16 = vsel %vm622_vm7, %v1272_v32, -1e+30  ;;  %v235_v32 = vpop.f32.mrf.mxu0 }
 0x3a5   :  { %v1300_v40 = vperm.slane %v1294_v16, 0 }
 0x3a7   :  { %v1304_v46 = vsel %vm1298_vm9, %v1300_v40, -inf  ;;  %v1302_v54 = vsel %vm1296_vm2, %v1300_v40, -inf }
 0x3ac   :  { %v238_v16 = vpop.f32.mrf.mxu0 }
 0x3af   :  { %v1291_v62 = vpop.f32.mrf.mxu2 }
 0x3b0   :  { %v1292_v41 = vadd.f32 %v1291_v62, %v1250_v63  ;;  %v1692_v62 = vpop.permute.xlu0 %1691 }
 0x3b2   :  { %v1295_v10 = vsel %vm623_vm8, %v1292_v41, -1e+30 }
 0x3b3   :  { %v1301_v17 = vperm.slane %v1295_v10, 0 }
 0x3b4   :  { %v241_v41 = vpop.f32.mrf.mxu0 }
 0x3b5   :  { %v1305_v14 = vsel %vm1299_vm14, %v1301_v17, -inf  ;;  %v1303_v37 = vsel %vm1297_vm3, %v1301_v17, -inf }
 0x3b6   :  { %v1309_v47 = vmax.f32 %v1304_v46, %v1305_v14  ;;  %v1306_v3 = vmax.f32 %v1302_v54, %v1303_v37 }
 0x3b8   :  { %1310 = vmax.xlane.f32.xlu2 %v1309_v47  ;;  %1307 = vmax.xlane.f32.xlu1 %v1306_v3  ;;  %v1688_v40 = vpop.permute.xlu0 %1687 }
 0x3bc   :  { %v244_v10 = vpop.f32.mrf.mxu0 }
 0x3c0   :  { %v1684_v17 = vpop.permute.xlu0 %1683 }
 0x3c8   :  { %v1680_v47 = vpop.permute.xlu0 %1679 }
 0x3c9   :  { %v3110_v3 = vadd.f32 %v1680_v47, %v235_v32 }
 0x42b   :  { %v1311_v58 = vpop.xlane.xlu2 %1310  ;;  %v1308_v8 = vpop.xlane.xlu1 %1307 }
 0x42c   :  { %v1314_v7 = vsub.f32 %v1304_v46, %v1311_v58  ;;  %v1315_v26 = vsub.f32 %v1305_v14, %v1311_v58  ;;  %v1312_v45 = vsub.f32 %v1302_v54, %v1308_v8  ;;  %v1313_v49 = vsub.f32 %v1303_v37, %v1308_v8 }
 0x42d   :  { %v1697_v46 = vadd.f32 %v1692_v62, %v244_v10  ;;  %v3104_v14 = vadd.f32 %v1688_v40, %v241_v41  ;;  %v2003_v58 = vmul.f32 -1.442695, %v3110_v3 }
 0x42e   :  { %v1316_v59 = vmax.f32 %v1312_v45, %v1314_v7  ;;  %v1323_v25 = vmax.f32 %v1313_v49, %v1315_v26 }
 0x42f   :  { %v2005_v54 = vmul.f32 -1.442695, %v3104_v14 }
 0x430   :  { %v1317_v51 = vrot.slane %v1316_v59, 4  ;;  %v1324_v57 = vrot.slane %v1323_v25, 4 }
 0x432   :  { %v1318_v36 = vmax.f32 %v1316_v59, %v1317_v51  ;;  %v1325_v5 = vmax.f32 %v1323_v25, %v1324_v57 }
 0x434   :  { %v1319_v53 = vrot.slane %v1318_v36, 2  ;;  %v1326_v39 = vrot.slane %v1325_v5, 2 }
 0x436   :  { %v1320_v20 = vmax.f32 %v1318_v36, %v1319_v53  ;;  %v1327_v33 = vmax.f32 %v1325_v5, %v1326_v39 }
 0x438   :  { %v1321_v23 = vrot.slane %v1320_v20, 1  ;;  %v1328_v30 = vrot.slane %v1327_v33, 1 }
 0x43a   :  { %v1322_v0 = vmax.f32 %v1320_v20, %v1321_v23  ;;  %v1329_v6 = vmax.f32 %v1327_v33, %v1328_v30 }
 0x43c   :  { %v1330_v2 = vmul.f32 1.442695, %v1322_v0  ;;  %v1332_v42 = vmul.f32 1.442695, %v1329_v6 }
 0x43e   :  { %2118 = vpow2.f32 %v1330_v2 }
 0x43f   :  { %2120 = vpow2.f32 %v1332_v42 }
 0x444   :  { %v3094_v29 = vpop.eup %2118 }
 0x445   :  { %v3096_v22 = vpop.eup %2120  ;;  %1350 = vmatmul.f32.vlgmr.msrb.gmra.mxu3 %v3094_v29 }
 0x446   :  { %1370 = vmatmul.f32.vlgmr.msrb.gmra.mxu1 %v3096_v22 }
 0x447   :  { %1861 = vmatpush.xpose.msrb.mxu1 %v2810_v13  ;;  %v3106_v13 = vadd.f32 %v1684_v17, %v238_v16 }
 0x449   :  { %v2004_v37 = vmul.f32 -1.442695, %v3106_v13 }
 0x44b   :  { %1862 = vmatpush.xpose.msrb.mxu1 %v2817_v4  ;;  %v2006_v4 = vmul.f32 -1.442695, %v1697_v46 }
 0x44d   :  { %2122 = vpow2.f32 %v2006_v4 }
 0x44e   :  { %2124 = vpow2.f32 %v2005_v54 }
 0x44f   :  { %2126 = vpow2.f32 %v2004_v37 }
 0x450   :  { %2128 = vpow2.f32 %v2003_v58 }
 0x453   :  { %v2123_v56 = vpop.eup %2122 }
 0x454   :  { %v2125_v55 = vpop.eup %2124  ;;  %v1713_v8 = vadd.f32 1.0, %v2123_v56 }
 0x455   :  { %v2127_v7 = vpop.eup %2126  ;;  %v1712_v26 = vadd.f32 1.0, %v2125_v55 }
 0x456   :  { %v1711_v45 = vadd.f32 1.0, %v2127_v7  ;;  %2130 = vrcp.f32 %v1713_v8  ;;  %v2129_v49 = vpop.eup %2128  ;;  %v1770_v20 = vand.u32 2147483648, %v1713_v8  ;;  %vm1764_vm7 = vweird.f32 %v1713_v8 }
 0x457   :  { %2132 = vrcp.f32 %v1712_v26  ;;  %v1710_v25 = vadd.f32 1.0, %v2129_v49  ;;  %v1768_v23 = vand.u32 2147483647, %v1713_v8  ;;  %v1755_v6 = vand.u32 2147483648, %v1712_v26 }
 0x458   :  { %2134 = vrcp.f32 %v1711_v45  ;;  %v1771_v30 = vor.u32 1.1754944e-38, %v1770_v20  ;;  %vm1749_vm6 = vweird.f32 %v1712_v26  ;;  %vm1734_vm12 = vweird.f32 %v1711_v45 }
 0x459   :  { %2136 = vrcp.f32 %v1710_v25  ;;  %vm1769_vm5 = vcmp.eq.f32.partialorder %v1768_v23, 8.507059e+37  ;;  %v1756_v32 = vor.u32 1.1754944e-38, %v1755_v6  ;;  %v1738_v10 = vand.u32 2147483647, %v1711_v45 }
 0x45a   :  { %v1740_v17 = vand.u32 2147483648, %v1711_v45  ;;  %vm1719_vm14 = vweird.f32 %v1710_v25  ;;  %v1723_v58 = vand.u32 2147483647, %v1710_v25 }
 0x45b   :  { %vm1739_vm2 = vcmp.eq.f32.partialorder %v1738_v10, 8.507059e+37 }
 0x45c   :  { %v2131_v52 = vpop.eup %2130 }
 0x45d   :  { %v2133_v59 = vpop.eup %2132  ;;  %v1760_v51 = vmul.f32 %v2131_v52, %v1713_v8  ;;  %vm1765_vm8 = vweird.f32 %v2131_v52  ;;  %v1725_v8 = vand.u32 2147483648, %v1710_v25 }
 0x45e   :  { %v2135_v57 = vpop.eup %2134  ;;  %v1745_v5 = vmul.f32 %v2133_v59, %v1712_v26  ;;  %vm1766_vm13 = vmor %vm1764_vm7, %vm1765_vm8  ;;  %vm1750_vm10 = vweird.f32 %v2133_v59  ;;  %vm1724_vm8 = vcmp.eq.f32.partialorder %v1723_v58, 8.507059e+37 }
 0x45f   :  { %v1761_v36 = vsub.f32 1.0, %v1760_v51  ;;  %v1730_v21 = vmul.f32 %v2135_v57, %v1711_v45  ;;  %v2137_v48 = vpop.eup %2136  ;;  %vm1751_vm11 = vmor %vm1749_vm6, %vm1750_vm10  ;;  %vm1735_vm15 = vweird.f32 %v2135_v57  ;;  %v1726_v49 = vor.u32 1.1754944e-38, %v1725_v8  ;;  %v2158_v51 = vld [vmem:[%s3223_s8] sm:$0xff] }
 0x460   :  { %v1746_v39 = vsub.f32 1.0, %v1745_v5  ;;  %vm3113_vm9 = vmor %vm1734_vm12, %vm1735_vm15  ;;  %v1715_v37 = vmul.f32 %v2137_v48, %v1710_v25  ;;  %vm1720_vm3 = vweird.f32 %v2137_v48 }
 0x461   :  { %v1762_v53 = vmul.f32 %v2131_v52, %v1761_v36  ;;  %v1731_v2 = vsub.f32 1.0, %v1730_v21  ;;  %vm1721_vm7 = vmor %vm1719_vm14, %vm1720_vm3 }
 0x462   :  { %v1747_v0 = vmul.f32 %v2133_v59, %v1746_v39  ;;  %v1716_v55 = vsub.f32 1.0, %v1715_v37 }
 0x463   :  { %v1763_v33 = vadd.f32 %v2131_v52, %v1762_v53  ;;  %v1732_v62 = vmul.f32 %v2135_v57, %v1731_v2 }
 0x464   :  { %v1717_v45 = vmul.f32 %v2137_v48, %v1716_v55 }
 0x465   :  { %v1767_v42 = vsel %vm1766_vm13, %v2131_v52, %v1763_v33  ;;  %v1733_v54 = vadd.f32 %v2135_v57, %v1732_v62  ;;  %v2196_v62 = vmov 4  }
 0x466   :  { %v1718_v52 = vadd.f32 %v2137_v48, %v1717_v45  ;;  %2031 = vset.pattern.permute.xlu2 %v2196_v62  ;;  %2033 = vset.pattern.permute.xlu0 %v2196_v62 }
 0x467   :  { %v1737_v56 = vsel %vm3113_vm9, %v2135_v57, %v1733_v54  ;;  %v1781_v57 = vrot.slane %v2158_v51, 1  ;;  %1516 = vperm.xlu2 %2031, %v3091_v11   ;;  %1524 = vperm.xlu0 %2033, %v3071_v61  }
 0x468   :  { %2032 = vset.pattern.permute.xlu1 %v2196_v62 }
 0x469   :  { %1520 = vperm.xlu1 %2032, %v3081_v24  }
 0x46f   :  { %2034 = vset.pattern.permute.xlu2 %v2194_v34  ;;  %1528 = vperm.xlu0 %2033, %v3061_v38  }
 0x470   :  { %1779 = vperm.xlu2 %2034, %v2158_v51  }
 0x4c3   :  { %v1371_v18 = vpop.f32.mrf.mxu1 }
 0x4c8   :  { %v1351_v31 = vpop.f32.mrf.mxu3 }
 0x4c9   :  { %v1372_v63 = vadd.f32 %v1371_v18, %v1351_v31  ;;  %v1772_v18 = vsel %vm1769_vm5, %v1771_v30, %v1767_v42  ;;  %v1748_v31 = vadd.f32 %v2133_v59, %v1747_v0 }
 0x4ca   :  { %v1777_v16 = vmul.f32 %v1772_v18, %v1697_v46  ;;  %v1741_v46 = vor.u32 1.1754944e-38, %v1740_v17 }
 0x4cb   :  { %1997 = vmatmul.msk.f32.vlgmr.msra.gmra.mxu2 %vm247_vm1, %v1372_v63  ;;  %1998 = vmatmul.msk.f32.vlgmr.msra.gmra.mxu3 %vm247_vm1, %v1372_v63  ;;  %v1753_v63 = vand.u32 2147483647, %v1712_v26  ;;  %v1752_v41 = vsel %vm1751_vm11, %v2133_v59, %v1748_v31 }
 0x4cc   :  { %1798 = vmatpush.msrb.mxu0 %v1777_v16  ;;  %v1742_v7 = vsel %vm1739_vm2, %v1741_v46, %v1737_v56 }
 0x4cd   :  { %vm1754_vm4 = vcmp.eq.f32.partialorder %v1753_v63, 8.507059e+37  ;;  %v1775_v26 = vmul.f32 %v1742_v7, %v3106_v13 }
 0x4ce   :  { %v1757_v4 = vsel %vm1754_vm4, %v1756_v32, %v1752_v41 }
 0x4cf   :  { %v1776_v47 = vmul.f32 %v1757_v4, %v3104_v14  ;;  %v1722_v14 = vsel %vm1721_vm7, %v2137_v48, %v1718_v52  ;;  %vm1871_vm7 = vcmask 124928  }
 0x4d0   :  { %v1727_v59 = vsel %vm1724_vm8, %v1726_v49, %v1722_v14 }
 0x4d1   :  { %1799 = vmatpush.msrb.mxu0 %v1776_v47  ;;  %v1774_v36 = vmul.f32 %v1727_v59, %v3110_v3 }
 0x4d3   :  { %1800 = vmatpush.msrb.mxu0 %v1775_v26 }
 0x4d5   :  { %1801 = vmatpush.msrb.mxu0 %v1774_v36 }
 0x4d6   :  { %2007 = vmatmul.msk.f32.vlgmr.msrb.gmra.mxu0 %vm85_vm0, %v1781_v57 }
 0x4d7   :  { %1841 = vmatpush.xpose.msra.mxu0 %v2794_v44 }
 0x4db   :  { %1842 = vmatpush.xpose.msra.mxu0 %v2803_v27 }
 0x54e   :  { %v1394_v13 = vpop.f32.mrf.mxu2  ;;  %v1414_v25 = vpop.f32.mrf.mxu3 }
 0x54f   :  { %2138 = vrcp.f32 %v1394_v13  ;;  %v1428_v33 = vand.u32 2147483648, %v1394_v13  ;;  %v1426_v3 = vand.u32 2147483647, %v1394_v13  ;;  %v1443_v0 = vand.u32 2147483648, %v1414_v25 }
 0x550   :  { %2140 = vrcp.f32 %v1414_v25  ;;  %v1441_v44 = vand.u32 2147483647, %v1414_v25  ;;  %vm1422_vm6 = vweird.f32 %v1394_v13  ;;  %vm1437_vm11 = vweird.f32 %v1414_v25 }
 0x551   :  { %v1429_v42 = vor.u32 1.1754944e-38, %v1428_v33  ;;  %vm1427_vm12 = vcmp.eq.f32.partialorder %v1426_v3, 8.507059e+37  ;;  %v1444_v18 = vor.u32 1.1754944e-38, %v1443_v0  ;;  %v1867_v3 = vld [vmem:[%s3217_s2] sm:$0x7]  ;;  %v2197_v0 = vmov 5  }
 0x552   :  { %vm1442_vm4 = vcmp.eq.f32.partialorder %v1441_v44, 8.507059e+37  ;;  %2035 = vset.pattern.permute.xlu1 %v2197_v0  ;;  %2036 = vset.pattern.permute.xlu0 %v2197_v0 }
 0x553   :  { %v1803_v56 = vpop.f32.mrf.mxu0  ;;  %1635 = vperm.xlu1 %2035, %v3091_v11   ;;  %1639 = vperm.xlu0 %2036, %v3081_v24  }
 0x554   :  { %2037 = vset.pattern.permute.xlu2 %v2197_v0 }
 0x555   :  { %v2139_v5 = vpop.eup %2138  ;;  %1643 = vperm.xlu2 %2037, %v3071_v61  }
 0x556   :  { %v2141_v53 = vpop.eup %2140  ;;  %v1418_v39 = vmul.f32 %v2139_v5, %v1394_v13  ;;  %vm1423_vm13 = vweird.f32 %v2139_v5 }
 0x557   :  { %v1433_v21 = vmul.f32 %v2141_v53, %v1414_v25  ;;  %vm1438_vm5 = vweird.f32 %v2141_v53  ;;  %vm1424_vm10 = vmor %vm1422_vm6, %vm1423_vm13 }
 0x558   :  { %v1419_v20 = vsub.f32 1.0, %v1418_v39  ;;  %vm1439_vm15 = vmor %vm1437_vm11, %vm1438_vm5 }
 0x559   :  { %v1434_v23 = vsub.f32 1.0, %v1433_v21 }
 0x55a   :  { %v1420_v30 = vmul.f32 %v2139_v5, %v1419_v20 }
 0x55b   :  { %v1435_v6 = vmul.f32 %v2141_v53, %v1434_v23  ;;  %1647 = vperm.xlu1 %2035, %v3061_v38  }
 0x55c   :  { %v1421_v2 = vadd.f32 %v2139_v5, %v1420_v30 }
 0x55d   :  { %v1436_v48 = vadd.f32 %v2141_v53, %v1435_v6 }
 0x55e   :  { %v1425_v27 = vsel %vm1424_vm10, %v2139_v5, %v1421_v2 }
 0x55f   :  { %v1430_v31 = vsel %vm1427_vm12, %v1429_v42, %v1425_v27  ;;  %v1440_v63 = vsel %vm1439_vm15, %v2141_v53, %v1436_v48  ;;  %v76_v48 = vld [vmem:[%s3220_s5 + $0xe0] sm:$0xff]  ;;  %v2198_v27 = vmov 6  }
 0x560   :  { %v1431_v32 = vmul.f32 %v3094_v29, %v1430_v31  ;;  %v1445_v16 = vsel %vm1442_vm4, %v1444_v18, %v1440_v63  ;;  %2040 = vset.pattern.permute.xlu0 %v2198_v27  ;;  %v77_v18 = vld [vmem:[%s3220_s5 + $0xe8] sm:$0xff]  ;;  %2038 = vset.pattern.permute.xlu2 %v2198_v27  ;;  %v78_v31 = vld [vmem:[%s3220_s5 + $0xf0] sm:$0xff] }
 0x561   :  { %v1446_v41 = vmul.f32 %v3096_v22, %v1445_v16  ;;  %1663 = vperm.xlu0 %2040, %v3071_v61   ;;  %1655 = vperm.xlu2 %2038, %v3091_v11   ;;  %v79_v61 = vld [vmem:[%s3220_s5 + $0xf8] sm:$0xff]  ;;  %v1525_v11 = vpop.permute.xlu0 %1524  ;;  %v2200_v16 = vmov 32.0  }
 0x562   :  { %v1447_v40 = vperm.slane %v1431_v32, 0 }
 0x563   :  { %v1448_v10 = vperm.slane %v1446_v41, 0  ;;  %2039 = vset.pattern.permute.xlu1 %v2198_v27 }
 0x564   :  { %v1449_v17 = vmul.f32 %v1447_v40, %v2544_v9  ;;  %v1825_v4 = vmul.f32 %v1447_v40, %v2473_v19  ;;  %v1451_v22 = vmul.f32 %v1447_v40, %v2549_v50  ;;  %v1453_v9 = vmul.f32 %v1447_v40, %v2553_v12  ;;  %v3145_v50 = vpop.permute.xlu2 %1516  ;;  %1659 = vperm.xlu1 %2039, %v3081_v24  }
 0x565   :  { %v1450_v29 = vmul.f32 %v1448_v10, %v3038_v35  ;;  %v1452_v54 = vmul.f32 %v1448_v10, %v3040_v43  ;;  %v1454_v19 = vmul.f32 %v1448_v10, %v3042_v60  ;;  %v1455_v35 = vmul.f32 %v1447_v40, %v2559_v15  ;;  %v2159_v40 = vld [vmem:[%s3215_s0 + $0x8] sm:$0xff] }
 0x566   :  { %1473 = vmatmul.f32.vlgmr.msra.gmra.mxu1 %v1449_v17  ;;  %1843 = vmatmul.f32.vlgmr.msra.gmra.mxu0 %v1825_v4  ;;  %v1456_v37 = vmul.f32 %v1448_v10, %v3044_v1  ;;  %v1826_v47 = vmul.f32 %v1448_v10, %v2484_v28  ;;  %v2160_v17 = vld [vmem:[%s3215_s0] sm:$0xff] }
 0x567   :  { %1502 = vmatmul.f32.vlgmr.msrb.gmra.mxu2 %v1450_v29  ;;  %v2161_v29 = vld [vmem:[%s3215_s0 + $0x10] sm:$0xff] }
 0x569   :  { %2041 = vset.pattern.permute.xlu0 %v2194_v34  ;;  %1667 = vperm.xlu2 %2038, %v3061_v38   ;;  %v1521_v38 = vpop.permute.xlu1 %1520 }
 0x56c   :  { %v1780_v43 = vpop.permute.xlu2 %1779 }
 0x56d   :  { %v1782_v46 = vrot.slane %v1780_v43, 2 }
 0x56e   :  { %1476 = vmatmul.f32.gmra.mxu1 %v1451_v22 }
 0x56f   :  { %1505 = vmatmul.f32.gmra.mxu2 %v1452_v54  ;;  %v1804_v55 = vadd.f32 %v1803_v56, %v1782_v46  ;;  %v2162_v56 = vld [vmem:[%s3215_s0 + $0x18] sm:$0xff] }
 0x571   :  { %v2008_v12 = vmul.f32 -1.442695, %v1804_v55 }
 0x573   :  { %2142 = vpow2.f32 %v2008_v12 }
 0x576   :  { %1479 = vmatmul.f32.gmra.mxu1 %v1453_v9 }
 0x577   :  { %1508 = vmatmul.f32.gmra.mxu2 %v1454_v19  ;;  %v1529_v19 = vpop.permute.xlu0 %1528 }
 0x579   :  { %v2143_v60 = vpop.eup %2142 }
 0x57a   :  { %v1809_v58 = vadd.f32 1.0, %v2143_v60 }
 0x57c   :  { %2144 = vrcp.f32 %v1809_v58  ;;  %vm1815_vm9 = vweird.f32 %v1809_v58  ;;  %v1821_v14 = vand.u32 2147483648, %v1809_v58  ;;  %v1819_v51 = vand.u32 2147483647, %v1809_v58 }
 0x57d   :  { %2146 = vrcp.f32 %v2200_v16 }
 0x57e   :  { %1482 = vmatmul.f32.gmra.mxu1 %v1455_v35  ;;  %v1822_v13 = vor.u32 1.1754944e-38, %v1821_v14  ;;  %vm1820_vm3 = vcmp.eq.f32.partialorder %v1819_v51, 8.507059e+37 }
 0x57f   :  { %1511 = vmatmul.f32.gmra.mxu2 %v1456_v37 }
 0x582   :  { %v2145_v15 = vpop.eup %2144 }
 0x583   :  { %v1811_v26 = vmul.f32 %v2145_v15, %v1809_v58  ;;  %vm1816_vm14 = vweird.f32 %v2145_v15  ;;  %v2147_v54 = vpop.eup %2146 }
 0x584   :  { %vm1817_vm2 = vmor %vm1815_vm9, %vm1816_vm14  ;;  %v1590_v43 = vmul.f32 32.0, %v2147_v54 }
 0x585   :  { %v1812_v45 = vsub.f32 1.0, %v1811_v26 }
 0x586   :  { %1863 = vmatmul.f32.vlgmr.msrb.gmra.mxu1 %v1826_v47  ;;  %v1591_v58 = vsub.f32 1.0, %v1590_v43 }
 0x587   :  { %v1813_v52 = vmul.f32 %v2145_v15, %v1812_v45 }
 0x589   :  { %v1814_v59 = vadd.f32 %v2145_v15, %v1813_v52 }
 0x58b   :  { %v1818_v25 = vsel %vm1817_vm2, %v2145_v15, %v1814_v59 }
 0x58c   :  { %v1823_v5 = vsel %vm1820_vm3, %v1822_v13, %v1818_v25 }
 0x58d   :  { %v1868_v39 = vperm.slane %v1823_v5, 0 }
 0x5e3   :  { %v1474_v8 = vpop.f32.mrf.mxu1  ;;  %v1844_v21 = vpop.f32.mrf.mxu0 }
 0x5ea   :  { %v1503_v7 = vpop.f32.mrf.mxu2 }
 0x5eb   :  { %v1477_v1 = vpop.f32.mrf.mxu1  ;;  %v1504_v42 = vadd.f32 %v1503_v7, %v1474_v8  ;;  %v1592_v7 = vmul.f32 %v2147_v54, %v1591_v58 }
 0x5ed   :  { %v1593_v45 = vadd.f32 %v2147_v54, %v1592_v7 }
 0x5f2   :  { %v1506_v49 = vpop.f32.mrf.mxu2 }
 0x5f3   :  { %v1480_v28 = vpop.f32.mrf.mxu1  ;;  %v1507_v44 = vadd.f32 %v1506_v49, %v1477_v1 }
 0x5fa   :  { %v1509_v57 = vpop.f32.mrf.mxu2 }
 0x5fb   :  { %v1483_v36 = vpop.f32.mrf.mxu1  ;;  %v1510_v30 = vadd.f32 %v1509_v57, %v1480_v28 }
 0x602   :  { %v1512_v53 = vpop.f32.mrf.mxu2 }
 0x603   :  { %v1513_v20 = vadd.f32 %v1512_v53, %v1483_v36  ;;  %v1864_v33 = vpop.f32.mrf.mxu1 }
 0x604   :  { %v1865_v23 = vadd.f32 %v1864_v33, %v1844_v21 }
 0x605   :  { %1555 = vmatpush.msrb.mxu3 %v1513_v20 }
 0x606   :  { %v1869_v6 = vmul.f32 %v1868_v39, %v1865_v23 }
 0x607   :  { %1556 = vmatpush.msrb.mxu3 %v1510_v30 }
 0x608   :  { %v1870_v2 = vadd.f32 %v1869_v6, %v1867_v3 }
 0x609   :  { %1557 = vmatpush.msrb.mxu3 %v1507_v44 }
 0x60a   :  { %1872 = vst.msk [vmem:[#allocation2] sm:$0x7] %vm1871_vm7, %v1870_v2 }
 0x60b   :  { %1558 = vmatpush.msrb.mxu3 %v1504_v42  ;;  %1885 = dma.vmem_to_hbm [thread:$0]  %s1881_s30, 64, %s1883_s29, [#allocation3]  }
 0x60c   :  { %1999 = vmatmul.msk.f32.vlgmr.msrb.gmra.mxu3 %vm85_vm0, %v76_v48 }
 0x614   :  { %2000 = vmatmul.msk.f32.gmra.mxu3 %vm85_vm0, %v77_v18 }
 0x61c   :  { %2001 = vmatmul.msk.f32.gmra.mxu3 %vm85_vm0, %v78_v31 }
 0x624   :  { %2002 = vmatmul.msk.f32.gmra.mxu3 %vm85_vm0, %v79_v61  ;;  %vm1594_vm0 = vweird.f32 %v2147_v54  ;;  %v1636_v61 = vpop.permute.xlu1 %1635 }
 0x625   :  { %v1595_v52 = vsel %vm1594_vm0, %v2147_v54, %v1593_v45 }
 0x62c   :  { %v1648_v16 = vpop.permute.xlu1 %1647 }
 0x634   :  { %v1660_v54 = vpop.permute.xlu1 %1659 }
 0x68f   :  { %v1560_v34 = vpop.f32.mrf.mxu3 }
 0x690   :  { %v1561_v62 = vadd.f32 %v1560_v34, %v3145_v50  ;;  %v1644_v34 = vpop.permute.xlu2 %1643 }
 0x692   :  { %v1572_v4 = vadd.f32 %v2160_v17, %v1561_v62 }
 0x694   :  { %v1576_v37 = vsel %vm247_vm1, %v1572_v4, 0.0 }
 0x697   :  { %v1563_v24 = vpop.f32.mrf.mxu3 }
 0x698   :  { %v1564_v63 = vadd.f32 %v1563_v24, %v1521_v38  ;;  %v1656_v62 = vpop.permute.xlu2 %1655 }
 0x69a   :  { %v1573_v10 = vadd.f32 %v2159_v40, %v1564_v63  ;;  %v1640_v63 = vpop.permute.xlu0 %1639 }
 0x69c   :  { %v1577_v9 = vsel %vm247_vm1, %v1573_v10, 0.0 }
 0x69d   :  { %v1578_v46 = vadd.f32 %v1577_v9, %v1576_v37 }
 0x69f   :  { %v1566_v32 = vpop.f32.mrf.mxu3 }
 0x6a0   :  { %v1567_v41 = vadd.f32 %v1566_v32, %v1525_v11 }
 0x6a2   :  { %v1574_v22 = vadd.f32 %v2161_v29, %v1567_v41  ;;  %v1664_v9 = vpop.permute.xlu0 %1663 }
 0x6a4   :  { %v1579_v47 = vsel %vm247_vm1, %v1574_v22, 0.0 }
 0x6a5   :  { %v1580_v12 = vadd.f32 %v1579_v47, %v1578_v46 }
 0x6a7   :  { %v1569_v35 = vpop.f32.mrf.mxu3 }
 0x6a8   :  { %v1570_v50 = vadd.f32 %v1569_v35, %v1529_v19 }
 0x6aa   :  { %v1575_v55 = vadd.f32 %v2162_v56, %v1570_v50  ;;  %v1668_v56 = vpop.permute.xlu2 %1667 }
 0x6ac   :  { %v1581_v60 = vsel %vm247_vm1, %v1575_v55, 0.0 }
 0x6ad   :  { %v1582_v8 = vadd.f32 %v1581_v60, %v1580_v12 }
 0x6af   :  { %v1583_v15 = vrot.slane %v1582_v8, 4 }
 0x6b1   :  { %v1584_v1 = vadd.f32 %v1583_v15, %v1582_v8 }
 0x6b3   :  { %v1585_v26 = vrot.slane %v1584_v1, 2 }
 0x6b5   :  { %v1586_v49 = vadd.f32 %v1585_v26, %v1584_v1 }
 0x6b7   :  { %v1587_v28 = vrot.slane %v1586_v49, 1 }
 0x6b9   :  { %v1588_v14 = vadd.f32 %v1587_v28, %v1586_v49 }
 0x6bb   :  { %v1596_v59 = vmul.f32 %v1595_v52, %v1588_v14 }
 0x6bd   :  { %v1597_v51 = vsub.f32 %v1572_v4, %v1596_v59  ;;  %v1598_v57 = vsub.f32 %v1573_v10, %v1596_v59  ;;  %v1600_v36 = vsub.f32 %v1575_v55, %v1596_v59  ;;  %v1599_v13 = vsub.f32 %v1574_v22, %v1596_v59 }
 0x6bf   :  { %v1601_v25 = vmul.f32 %v1597_v51, %v1597_v51  ;;  %v1602_v5 = vmul.f32 %v1598_v57, %v1598_v57  ;;  %v1603_v53 = vmul.f32 %v1599_v13, %v1599_v13  ;;  %v1604_v39 = vmul.f32 %v1600_v36, %v1600_v36 }
 0x6c1   :  { %v1605_v21 = vsel %vm247_vm1, %v1601_v25, 0.0  ;;  %v1606_v20 = vsel %vm247_vm1, %v1602_v5, 0.0  ;;  %v1608_v23 = vsel %vm247_vm1, %v1603_v53, 0.0  ;;  %v1610_v3 = vsel %vm247_vm1, %v1604_v39, 0.0 }
 0x6c2   :  { %v1607_v33 = vadd.f32 %v1606_v20, %v1605_v21 }
 0x6c4   :  { %v1609_v30 = vadd.f32 %v1608_v23, %v1607_v33 }
 0x6c6   :  { %v1611_v0 = vadd.f32 %v1610_v3, %v1609_v30 }
 0x6c8   :  { %v1612_v6 = vrot.slane %v1611_v0, 4 }
 0x6ca   :  { %v1613_v44 = vadd.f32 %v1612_v6, %v1611_v0 }
 0x6cc   :  { %v1614_v2 = vrot.slane %v1613_v44, 2 }
 0x6ce   :  { %v1615_v42 = vadd.f32 %v1614_v2, %v1613_v44 }
 0x6d0   :  { %v1616_v48 = vrot.slane %v1615_v42, 1 }
 0x6d2   :  { %v1617_v27 = vadd.f32 %v1616_v48, %v1615_v42 }
 0x6d4   :  { %v1618_v18 = vmul.f32 %v1617_v27, %v1595_v52 }
 0x6d6   :  { %v1619_v31 = vadd.f32 1e-05, %v1618_v18 }
 0x6d8   :  { %2148 = vrsqrt.f32 %v1619_v31  ;;  %vm1626_vm13 = vweird.f32 %v1619_v31 }
 0x6de   :  { %v2149_v24 = vpop.eup %2148 }
 0x6df   :  { %v1621_v38 = vmul.f32 %v2149_v24, %v1619_v31  ;;  %vm1627_vm8 = vweird.f32 %v2149_v24 }
 0x6e0   :  { %vm1628_vm5 = vmor %vm1626_vm13, %vm1627_vm8 }
 0x6e1   :  { %v1622_v11 = vmul.f32 %v2149_v24, %v1621_v38 }
 0x6e3   :  { %v1623_v32 = vmul.f32 0.5, %v1622_v11 }
 0x6e5   :  { %v1624_v41 = vsub.f32 1.5, %v1623_v32 }
 0x6e7   :  { %v1625_v40 = vmul.f32 %v2149_v24, %v1624_v41 }
 0x6e9   :  { %v1629_v10 = vsel %vm1628_vm5, %v2149_v24, %v1625_v40 }
 0x6ea   :  { %v1632_v17 = vmul.f32 %v1629_v10, %v1599_v13  ;;  %v1630_v4 = vmul.f32 %v1629_v10, %v1597_v51  ;;  %v1633_v29 = vmul.f32 %v1629_v10, %v1600_v36  ;;  %v1631_v22 = vmul.f32 %v1629_v10, %v1598_v57 }
 0x6ec   :  { %v1652_v19 = vmul.f32 %v1644_v34, %v1632_v17  ;;  %v1650_v35 = vmul.f32 %v1636_v61, %v1630_v4  ;;  %v1653_v37 = vmul.f32 %v1648_v16, %v1633_v29  ;;  %v1651_v47 = vmul.f32 %v1640_v63, %v1631_v22 }
 0x6ee   :  { %v1670_v50 = vadd.f32 %v1656_v62, %v1650_v35  ;;  %v1671_v43 = vadd.f32 %v1660_v54, %v1651_v47  ;;  %v1672_v46 = vadd.f32 %v1664_v9, %v1652_v19  ;;  %v1673_v55 = vadd.f32 %v1668_v56, %v1653_v37 }
 0x6f0   :  { %1674 = vst.msk [vmem:[%s3224_s9] sm:$0xff] %vm247_vm1, %v1670_v50 }
 0x6f1   :  { %1675 = vst.msk [vmem:[%s3224_s9 + $0x8] sm:$0xff] %vm247_vm1, %v1671_v43 }
 0x6f2   :  { %1676 = vst.msk [vmem:[%s3224_s9 + $0x10] sm:$0xff] %vm247_vm1, %v1672_v46 }
 0x6f3   :  { %1677 = vst.msk [vmem:[%s3224_s9 + $0x18] sm:$0xff] %vm247_vm1, %v1673_v55 }
 0x6f4   :  { %2187 = dma.done.wait [#allocation3], 64  }
 0x6f5   :  { %2188 = vsyncadd [#allocation3], 4294967232 }
 0x6f6   :  { %1892 = vsyncpa [#allocation3], 1 }

</bundles_post_ra>
